<compile_context>
chip_gen: v7x
topology: tpu7x:2x2x1
jax: 0.10.0
libtpu: 0.0.40
codegen_flags: <defaults>
</compile_context>

<pallas_src>
import jax
import jax.numpy as jnp
from jax import lax
from jax.experimental import pallas as pl
from jax.experimental.pallas import tpu as pltpu

LANES = 128
UNDISTORT_EPS = 1e-6
UNDISTORT_ITERS = 10

_DISTORT_SLAB = 16     # rows per inner step (2 vregs per temporary)
_UNDISTORT_SLAB = 8    # rows per inner step (1 vreg per temporary -> no spills)


def _round_up(x, m):
    return ((x + m - 1) // m) * m


def _cdiv(a, b):
    return -(-a // b)


def opencv8_params(params_list):
    p = jnp.asarray(params_list, jnp.float32).reshape(-1)
    if p.shape[0] < 8:
        p = jnp.pad(p, (0, 8 - p.shape[0]))
    return p[:8]


def _pick_grid(rows_needed, block_rows, align):
    """Choose (block_rows, grid_steps).  Single block when everything fits (no
    forced split on single-TensorCore chips); for multi-step grids use an even
    step count so the two v7x TensorCores get balanced work (harmless on v5e/v6e)."""
    block_rows = _round_up(max(block_rows, align), align)
    rows_a = _round_up(max(rows_needed, 1), align)
    steps = _cdiv(rows_a, block_rows)
    if steps > 1 and steps % 2 == 1:
        steps += 1
    br = _round_up(_cdiv(rows_a, steps), align)
    return br, steps


def _load_params(params_ref):
    # OpenCV ordering: k1, k2, p1, p2, k3, k4, k5, k6  (SMEM scalar reads)
    return (params_ref[0], params_ref[1], params_ref[2], params_ref[3],
            params_ref[4], params_ref[5], params_ref[6], params_ref[7])


# ----------------------------- Pallas kernels --------------------------------
def _distort_kernel(params_ref, uv_ref, out_ref):
    """sensor_to_frustum=False: forward OpenCV 8-param distortion.

    Layout: (rows, 128) f32, lane-interleaved u/v (raw memory order of a
    flattened (N, 2) array -> the wrapper does no transpose).
    """
    k1, k2, p1, p2, k3, k4, k5, k6 = _load_params(params_ref)
    rows, cols = uv_ref.shape
    slab = _DISTORT_SLAB
    shape = (slab, cols)

    # ---- loop-invariant vectors (hoisted; broadcasts are not CSE'd) ----
    lane = lax.broadcasted_iota(jnp.int32, shape, 1)
    even = (lane & 1) == 0
    # pltpu.roll sign-convention probe: works whether roll(x, 1)[j] == x[j-1]
    # or x[j+1]; wrap-around lanes are never selected for actual use.
    lane_f = lane.astype(jnp.float32)
    prev_f = jnp.where(lane == 0, jnp.float32(cols - 1), lane_f - 1.0)
    one_is_prev = pltpu.roll(lane_f, 1, axis=1) == prev_f
    sel_rm = even == one_is_prev                 # lanes taking the roll-by-(cols-1) value

    vk1 = jnp.full(shape, k1); vk2 = jnp.full(shape, k2); vk3 = jnp.full(shape, k3)
    vk4 = jnp.full(shape, k4); vk5 = jnp.full(shape, k5); vk6 = jnp.full(shape, k6)
    two_pa = jnp.where(even, 2.0 * p1, 2.0 * p2)   # tangential coeff on z*s
    pb = jnp.where(even, p2, p1)                    # tangential coeff on r2 + 2*z^2

    def body(i, carry):
        r0 = pl.multiple_of(i * slab, slab)
        z = uv_ref[pl.ds(r0, slab), :]
        r_a = pltpu.roll(z, 1, axis=1)               # XLU slot (idle here)
        r_b = pltpu.roll(z, cols - 1, axis=1)
        s = jnp.where(sel_rm, r_b, r_a)              # partner coord (v at u-lanes, u at v-lanes)
        z2 = z * z
        r2 = z2 + s * s
        num = 1.0 + r2 * (vk1 + r2 * (vk2 + r2 * vk3))
        den = 1.0 + r2 * (vk4 + r2 * (vk5 + r2 * vk6))
        inv = pl.reciprocal(den, approx=True)        # EUP slot
        inv = inv * (2.0 - den * inv)                # one Newton refine -> ~f32 accurate
        radial = num * inv
        tang = two_pa * (z * s) + pb * (r2 + (z2 + z2))
        out_ref[pl.ds(r0, slab), :] = z * radial + tang
        return carry

    lax.fori_loop(0, rows // slab, body, 0)


def _undistort_kernel(params_ref, uv_ref, out_ref):
    """sensor_to_frustum=True: 10-step Newton inverse of the distortion.

    Layout: (2, rows, 128) planes so symmetric per-point quantities are computed
    once.  Strip-mined in 8-row slabs so the fully unrolled Newton trace keeps
    every temporary in a single vreg (no VMEM spills).
    """
    k1, k2, p1, p2, k3, k4, k5, k6 = _load_params(params_ref)
    rows = uv_ref.shape[1]
    slab = _UNDISTORT_SLAB
    shape = (slab, uv_ref.shape[2])

    # hoisted scalar folds + splats (loop-invariant)
    vk1 = jnp.full(shape, k1); vk2 = jnp.full(shape, k2); vk3 = jnp.full(shape, k3)
    vk4 = jnp.full(shape, k4); vk5 = jnp.full(shape, k5); vk6 = jnp.full(shape, k6)
    v2k2 = jnp.full(shape, 2.0 * k2); v3k3 = jnp.full(shape, 3.0 * k3)
    v2k5 = jnp.full(shape, 2.0 * k5); v3k6 = jnp.full(shape, 3.0 * k6)
    vp1 = jnp.full(shape, p1); vp2 = jnp.full(shape, p2)
    v2p1 = jnp.full(shape, 2.0 * p1); v2p2 = jnp.full(shape, 2.0 * p2)
    v6p1 = jnp.full(shape, 6.0 * p1); v6p2 = jnp.full(shape, 6.0 * p2)

    def body(i, carry):
        r0 = pl.multiple_of(i * slab, slab)
        xd = uv_ref[0, pl.ds(r0, slab), :]
        yd = uv_ref[1, pl.ds(r0, slab), :]
        x = xd
        y = yd
        for _ in range(UNDISTORT_ITERS):           # fixed trip count -> unrolled
            x2 = x * x
            y2 = y * y
            r = x2 + y2
            alpha = 1.0 + r * (vk1 + r * (vk2 + r * vk3))
            beta = 1.0 + r * (vk4 + r * (vk5 + r * vk6))
            inv_beta = pl.reciprocal(beta, approx=True)      # EUP slot
            inv_beta = inv_beta * (2.0 - beta * inv_beta)    # refine: feeds the residual
            d = alpha * inv_beta
            xy = x * y

            fx = d * x + v2p1 * xy + vp2 * (r + (x2 + x2)) - xd
            fy = d * y + v2p2 * xy + vp1 * (r + (y2 + y2)) - yd

            alpha_r = vk1 + r * (v2k2 + r * v3k3)
            beta_r = vk4 + r * (v2k5 + r * v3k6)
            d_r = (alpha_r * beta - alpha * beta_r) * (inv_beta * inv_beta)
            d_x = (x + x) * d_r
            d_y = (y + y) * d_r

            fx_x = d + d_x * x + v2p1 * y + v6p2 * x
            fx_y = d_y * x + v2p1 * x + v2p2 * y
            fy_x = d_x * y + v2p2 * y + v2p1 * x
            fy_y = d + d_y * y + v2p2 * x + v6p1 * y

            denom = fy_x * fx_y - fx_x * fy_y
            mask = jnp.abs(denom) > UNDISTORT_EPS
            safe = jnp.where(mask, denom, 1.0)
            # approx reciprocal only scales the (self-correcting) Newton step
            inv_denom = jnp.where(mask, pl.reciprocal(safe, approx=True), 0.0)
            x = x + (fx * fy_y - fy * fx_y) * inv_denom
            y = y + (fy * fx_x - fx * fy_x) * inv_denom

        out_ref[0, pl.ds(r0, slab), :] = x
        out_ref[1, pl.ds(r0, slab), :] = y
        return carry

    lax.fori_loop(0, rows // slab, body, 0)


# ------------------------------- wrappers -------------------------------------
def _run_distort(flat, total, params, block_rows):
    """flat: (2N,) f32 interleaved u0,v0,u1,v1,...  Returns (2N,) f32."""
    rows_needed = _cdiv(total, LANES)
    br, steps = _pick_grid(rows_needed, block_rows, _DISTORT_SLAB)
    rows_p = br * steps
    pad = rows_p * LANES - total
    if pad:
        flat = jnp.pad(flat, (0, pad))
    z = flat.reshape(rows_p, LANES)              # pure reshape, no HBM shuffle

    out = pl.pallas_call(
        _distort_kernel,
        out_shape=jax.ShapeDtypeStruct((rows_p, LANES), jnp.float32),
        grid_spec=pltpu.PrefetchScalarGridSpec(
            num_scalar_prefetch=0,
            grid=(steps,),
            in_specs=[
                pl.BlockSpec(memory_space=pltpu.MemorySpace.SMEM),   # params (8,)
                pl.BlockSpec((br, LANES), lambda i: (i, 0)),
            ],
            out_specs=pl.BlockSpec((br, LANES), lambda i: (i, 0)),
        ),
        compiler_params=pltpu.CompilerParams(
            dimension_semantics=("parallel",)),
        cost_estimate=pl.CostEstimate(
            flops=int(rows_p * LANES * 35),
            transcendentals=int(rows_p * LANES),
            bytes_accessed=int(2 * rows_p * LANES * 4)),
    )(params, z)
    return out.reshape(-1)[:total]


def _run_undistort(pts, n, params, block_rows):
    """pts: (N, 2) f32.  Returns (N, 2) f32."""
    rows_needed = _cdiv(n, LANES)
    br, steps = _pick_grid(rows_needed, block_rows, _UNDISTORT_SLAB)
    rows_p = br * steps
    pad = rows_p * LANES - n
    if pad:
        pts = jnp.pad(pts, ((0, pad), (0, 0)))
    # one transpose pass: acceptable on this compute-bound path, and it keeps the
    # in-kernel Newton math at half the VALU cost of an interleaved formulation.
    planes = pts.T.reshape(2, rows_p, LANES)

    out = pl.pallas_call(
        _undistort_kernel,
        out_shape=jax.ShapeDtypeStruct((2, rows_p, LANES), jnp.float32),
        grid_spec=pltpu.PrefetchScalarGridSpec(
            num_scalar_prefetch=0,
            grid=(steps,),
            in_specs=[
                pl.BlockSpec(memory_space=pltpu.MemorySpace.SMEM),   # params (8,)
                pl.BlockSpec((2, br, LANES), lambda i: (0, i, 0)),
            ],
            out_specs=pl.BlockSpec((2, br, LANES), lambda i: (0, i, 0)),
        ),
        compiler_params=pltpu.CompilerParams(
            dimension_semantics=("parallel",)),
        cost_estimate=pl.CostEstimate(
            flops=int(rows_p * LANES * UNDISTORT_ITERS * 90),
            transcendentals=int(rows_p * LANES * UNDISTORT_ITERS * 2),
            bytes_accessed=int(4 * rows_p * LANES * 4)),
    )(params, planes)
    return out.reshape(2, rows_p * LANES).T[:n]


def opencv8_distortion_forward(uv, params, sensor_to_frustum=True, *,
                               distort_block_rows=4096, undistort_block_rows=512):
    """uv: (..., 2) float -> (..., 2) float32 (undistorted / distorted points)."""
    orig_shape = uv.shape
    assert orig_shape[-1] == 2
    n = 1
    for d in orig_shape[:-1]:
        n *= d
    params = opencv8_params(params)
    uv32 = uv.astype(jnp.float32)

    if sensor_to_frustum:
        res = _run_undistort(uv32.reshape(-1, 2), n, params, undistort_block_rows)
    else:
        res = _run_distort(uv32.reshape(-1), 2 * n, params, distort_block_rows)
    return res.reshape(orig_shape)

    # TODO(synk): LensDistortion.st_map is host-side meshgrid/stack plumbing around
    # this forward; it is left to plain XLA rather than implemented in the kernel.


# ----------------------------- pure-JAX references ----------------------------
def reference_distort(uv, params):
    k1, k2, p1, p2, k3, k4, k5, k6 = [params[i] for i in range(8)]
    u, v = uv[..., 0], uv[..., 1]
    r2 = u * u + v * v
    r4 = r2 * r2
    r6 = r4 * r2
    radial = (1 + k1 * r2 + k2 * r4 + k3 * r6) / (1 + k4 * r2 + k5 * r4 + k6 * r6)
    fx = 2 * p1 * u * v + p2 * (r2 + 2 * u * u)
    fy = 2 * p2 * u * v + p1 * (r2 + 2 * v * v)
    return jnp.stack([u * radial + fx, v * radial + fy], axis=-1)


def reference_undistort(uv, params, eps=UNDISTORT_EPS, iters=UNDISTORT_ITERS):
    k1, k2, p1, p2, k3, k4, k5, k6 = [params[i] for i in range(8)]
    xd, yd = uv[..., 0], uv[..., 1]
    x, y = xd, yd
    zeros = jnp.zeros_like(x)
    for _ in range(iters):
        r = x * x + y * y
        alpha = 1.0 + r * (k1 + r * (k2 + r * k3))
        beta = 1.0 + r * (k4 + r * (k5 + r * k6))
        d = alpha / beta
        fx = d * x + 2 * p1 * x * y + p2 * (r + 2 * x * x) - xd
        fy = d * y + 2 * p2 * x * y + p1 * (r + 2 * y * y) - yd
        alpha_r = k1 + r * (2.0 * k2 + r * (3.0 * k3))
        beta_r = k4 + r * (2.0 * k5 + r * (3.0 * k6))
        d_r = (alpha_r * beta - alpha * beta_r) / (beta * beta)
        d_x = 2.0 * x * d_r
        d_y = 2.0 * y * d_r
        fx_x = d + d_x * x + 2.0 * p1 * y + 6.0 * p2 * x
        fx_y = d_y * x + 2.0 * p1 * x + 2.0 * p2 * y
        fy_x = d_x * y + 2.0 * p2 * y + 2.0 * p1 * x
        fy_y = d + d_y * y + 2.0 * p2 * x + 6.0 * p1 * y
        denom = fy_x * fx_y - fx_x * fy_y
        mask = jnp.abs(denom) > eps
        x_num = fx * fy_y - fy * fx_y
        y_num = fy * fx_x - fx * fy_x
        safe = jnp.where(mask, denom, 1.0)
        x = x + jnp.where(mask, x_num / safe, zeros)
        y = y + jnp.where(mask, y_num / safe, zeros)
    return jnp.stack([x, y], axis=-1)


if __name__ == "__main__":
    key = jax.random.PRNGKey(0)
    k_uv, k_uv2 = jax.random.split(key)

    # OpenCV 8-param rational model: [k1, k2, p1, p2, k3, k4, k5, k6]
    params = opencv8_params([-0.05, 0.02, 0.001, -0.0005, 0.002, 0.01, -0.003, 0.001])

    # small st_map-like grid input (16 x 16 points, 2 channels)
    uv_grid = jax.random.uniform(k_uv, (16, 16, 2), jnp.float32,
                                 minval=-0.6, maxval=0.6)
    # a flat batch exercising multi-slab blocks and padding slice-off
    uv_flat = jax.random.uniform(k_uv2, (2000, 2), jnp.float32,
                                 minval=-0.6, maxval=0.6)

    # sensor_to_frustum=True (default): iterative undistortion
    out_undist = jax.block_until_ready(
        opencv8_distortion_forward(uv_grid, params, sensor_to_frustum=True))
    ref_undist = reference_undistort(uv_grid, params)
    assert out_undist.shape == uv_grid.shape and out_undist.dtype == jnp.float32
    assert jnp.allclose(out_undist, ref_undist, atol=2e-5, rtol=2e-5), \
        f"undistort max abs err {float(jnp.max(jnp.abs(out_undist - ref_undist)))}"

    # sensor_to_frustum=False: forward distortion (lane-interleaved kernel)
    out_dist = jax.block_until_ready(
        opencv8_distortion_forward(uv_flat, params, sensor_to_frustum=False))
    ref_dist = reference_distort(uv_flat, params)
    assert out_dist.shape == uv_flat.shape and out_dist.dtype == jnp.float32
    assert jnp.allclose(out_dist, ref_dist, atol=2e-5, rtol=2e-5), \
        f"distort max abs err {float(jnp.max(jnp.abs(out_dist - ref_dist)))}"

    # undistortion on the larger batch too
    out_undist2 = jax.block_until_ready(
        opencv8_distortion_forward(uv_flat, params, sensor_to_frustum=True))
    ref_undist2 = reference_undistort(uv_flat, params)
    assert jnp.allclose(out_undist2, ref_undist2, atol=2e-5, rtol=2e-5), \
        f"undistort2 max abs err {float(jnp.max(jnp.abs(out_undist2 - ref_undist2)))}"

    print("KERNEL_OK")
</pallas_src>

<mosaic_0001>
module attributes {stable_mosaic.version = 11 : i64} {
  func.func @_undistort_kernel(%arg0: i32, %arg1: memref<8xf32, #tpu.memory_space<smem>>, %arg2: memref<2x8x128xf32, #tpu.memory_space<vmem>>, %arg3: memref<2x8x128xf32, #tpu.memory_space<vmem>>) attributes {dimension_semantics = [#tpu.dimension_semantics<parallel>], iteration_bounds = array<i64: 1>, scalar_prefetch = 0 : i64, scratch_operands = 0 : i64, tpu.core_type = #tpu.core_type<tc>, window_params = [{transform_indices = @transform_0, window_bounds = array<i64: 8>}, {transform_indices = @transform_1, window_bounds = array<i64: 2, 8, 128>}, {transform_indices = @transform_2, window_bounds = array<i64: 2, 8, 128>}]} {
    %c0 = arith.constant 0 : index
    %0 = memref.load %arg1[%c0] : memref<8xf32, #tpu.memory_space<smem>>
    %c1 = arith.constant 1 : index
    %1 = memref.load %arg1[%c1] : memref<8xf32, #tpu.memory_space<smem>>
    %c2 = arith.constant 2 : index
    %2 = memref.load %arg1[%c2] : memref<8xf32, #tpu.memory_space<smem>>
    %c3 = arith.constant 3 : index
    %3 = memref.load %arg1[%c3] : memref<8xf32, #tpu.memory_space<smem>>
    %c4 = arith.constant 4 : index
    %4 = memref.load %arg1[%c4] : memref<8xf32, #tpu.memory_space<smem>>
    %c5 = arith.constant 5 : index
    %5 = memref.load %arg1[%c5] : memref<8xf32, #tpu.memory_space<smem>>
    %c6 = arith.constant 6 : index
    %6 = memref.load %arg1[%c6] : memref<8xf32, #tpu.memory_space<smem>>
    %c7 = arith.constant 7 : index
    %7 = memref.load %arg1[%c7] : memref<8xf32, #tpu.memory_space<smem>>
    %8 = vector.broadcast %0 : f32 to vector<8x128xf32>
    %9 = vector.broadcast %1 : f32 to vector<8x128xf32>
    %10 = vector.broadcast %4 : f32 to vector<8x128xf32>
    %11 = vector.broadcast %5 : f32 to vector<8x128xf32>
    %12 = vector.broadcast %6 : f32 to vector<8x128xf32>
    %13 = vector.broadcast %7 : f32 to vector<8x128xf32>
    %cst = arith.constant 2.000000e+00 : f32
    %14 = arith.mulf %cst, %1 : f32
    %15 = vector.broadcast %14 : f32 to vector<8x128xf32>
    %cst_0 = arith.constant 3.000000e+00 : f32
    %16 = arith.mulf %cst_0, %4 : f32
    %17 = vector.broadcast %16 : f32 to vector<8x128xf32>
    %cst_1 = arith.constant 2.000000e+00 : f32
    %18 = arith.mulf %cst_1, %6 : f32
    %19 = vector.broadcast %18 : f32 to vector<8x128xf32>
    %cst_2 = arith.constant 3.000000e+00 : f32
    %20 = arith.mulf %cst_2, %7 : f32
    %21 = vector.broadcast %20 : f32 to vector<8x128xf32>
    %22 = vector.broadcast %2 : f32 to vector<8x128xf32>
    %23 = vector.broadcast %3 : f32 to vector<8x128xf32>
    %cst_3 = arith.constant 2.000000e+00 : f32
    %24 = arith.mulf %cst_3, %2 : f32
    %25 = vector.broadcast %24 : f32 to vector<8x128xf32>
    %cst_4 = arith.constant 2.000000e+00 : f32
    %26 = arith.mulf %cst_4, %3 : f32
    %27 = vector.broadcast %26 : f32 to vector<8x128xf32>
    %cst_5 = arith.constant 6.000000e+00 : f32
    %28 = arith.mulf %cst_5, %2 : f32
    %29 = vector.broadcast %28 : f32 to vector<8x128xf32>
    %cst_6 = arith.constant 6.000000e+00 : f32
    %30 = arith.mulf %cst_6, %3 : f32
    %31 = vector.broadcast %30 : f32 to vector<8x128xf32>
    %c0_i32 = arith.constant 0 : i32
    %c8_i32 = arith.constant 8 : i32
    %32 = arith.muli %c0_i32, %c8_i32 : i32
    %33 = tpu.assume_multiple %32, 8 : i32
    %c0_7 = arith.constant 0 : index
    %34 = arith.index_cast %33 : i32 to index
    %c0_8 = arith.constant 0 : index
    %35 = vector.load %arg2[%c0_7, %34, %c0_8] : memref<2x8x128xf32, #tpu.memory_space<vmem>>, vector<1x8x128xf32>
    %36 = vector.shape_cast %35 : vector<1x8x128xf32> to vector<8x128xf32>
    %c1_9 = arith.constant 1 : index
    %37 = arith.index_cast %33 : i32 to index
    %c0_10 = arith.constant 0 : index
    %38 = vector.load %arg2[%c1_9, %37, %c0_10] : memref<2x8x128xf32, #tpu.memory_space<vmem>>, vector<1x8x128xf32>
    %39 = vector.shape_cast %38 : vector<1x8x128xf32> to vector<8x128xf32>
    %40 = arith.mulf %36, %36 : vector<8x128xf32>
    %41 = arith.mulf %39, %39 : vector<8x128xf32>
    %42 = arith.addf %40, %41 : vector<8x128xf32>
    %43 = arith.mulf %42, %10 : vector<8x128xf32>
    %44 = arith.addf %9, %43 : vector<8x128xf32>
    %45 = arith.mulf %42, %44 : vector<8x128xf32>
    %46 = arith.addf %8, %45 : vector<8x128xf32>
    %47 = arith.mulf %42, %46 : vector<8x128xf32>
    %cst_11 = arith.constant 1.000000e+00 : f32
    %48 = vector.broadcast %cst_11 : f32 to vector<8x128xf32>
    %49 = arith.addf %48, %47 : vector<8x128xf32>
    %50 = arith.mulf %42, %13 : vector<8x128xf32>
    %51 = arith.addf %12, %50 : vector<8x128xf32>
    %52 = arith.mulf %42, %51 : vector<8x128xf32>
    %53 = arith.addf %11, %52 : vector<8x128xf32>
    %54 = arith.mulf %42, %53 : vector<8x128xf32>
    %cst_12 = arith.constant 1.000000e+00 : f32
    %55 = vector.broadcast %cst_12 : f32 to vector<8x128xf32>
    %56 = arith.addf %55, %54 : vector<8x128xf32>
    %57 = tpu.reciprocal %56 {approx = true} : vector<8x128xf32> -> vector<8x128xf32>
    %58 = arith.mulf %56, %57 : vector<8x128xf32>
    %cst_13 = arith.constant 2.000000e+00 : f32
    %59 = vector.broadcast %cst_13 : f32 to vector<8x128xf32>
    %60 = arith.subf %59, %58 : vector<8x128xf32>
    %61 = arith.mulf %57, %60 : vector<8x128xf32>
    %62 = arith.mulf %49, %61 : vector<8x128xf32>
    %63 = arith.mulf %36, %39 : vector<8x128xf32>
    %64 = arith.mulf %62, %36 : vector<8x128xf32>
    %65 = arith.mulf %25, %63 : vector<8x128xf32>
    %66 = arith.addf %64, %65 : vector<8x128xf32>
    %67 = arith.addf %40, %40 : vector<8x128xf32>
    %68 = arith.addf %42, %67 : vector<8x128xf32>
    %69 = arith.mulf %23, %68 : vector<8x128xf32>
    %70 = arith.addf %66, %69 : vector<8x128xf32>
    %71 = arith.subf %70, %36 : vector<8x128xf32>
    %72 = arith.mulf %62, %39 : vector<8x128xf32>
    %73 = arith.mulf %27, %63 : vector<8x128xf32>
    %74 = arith.addf %72, %73 : vector<8x128xf32>
    %75 = arith.addf %41, %41 : vector<8x128xf32>
    %76 = arith.addf %42, %75 : vector<8x128xf32>
    %77 = arith.mulf %22, %76 : vector<8x128xf32>
    %78 = arith.addf %74, %77 : vector<8x128xf32>
    %79 = arith.subf %78, %39 : vector<8x128xf32>
    %80 = arith.mulf %42, %17 : vector<8x128xf32>
    %81 = arith.addf %15, %80 : vector<8x128xf32>
    %82 = arith.mulf %42, %81 : vector<8x128xf32>
    %83 = arith.addf %8, %82 : vector<8x128xf32>
    %84 = arith.mulf %42, %21 : vector<8x128xf32>
    %85 = arith.addf %19, %84 : vector<8x128xf32>
    %86 = arith.mulf %42, %85 : vector<8x128xf32>
    %87 = arith.addf %11, %86 : vector<8x128xf32>
    %88 = arith.mulf %83, %56 : vector<8x128xf32>
    %89 = arith.mulf %49, %87 : vector<8x128xf32>
    %90 = arith.subf %88, %89 : vector<8x128xf32>
    %91 = arith.mulf %61, %61 : vector<8x128xf32>
    %92 = arith.mulf %90, %91 : vector<8x128xf32>
    %93 = arith.addf %36, %36 : vector<8x128xf32>
    %94 = arith.mulf %93, %92 : vector<8x128xf32>
    %95 = arith.addf %39, %39 : vector<8x128xf32>
    %96 = arith.mulf %95, %92 : vector<8x128xf32>
    %97 = arith.mulf %94, %36 : vector<8x128xf32>
    %98 = arith.addf %62, %97 : vector<8x128xf32>
    %99 = arith.mulf %25, %39 : vector<8x128xf32>
    %100 = arith.addf %98, %99 : vector<8x128xf32>
    %101 = arith.mulf %31, %36 : vector<8x128xf32>
    %102 = arith.addf %100, %101 : vector<8x128xf32>
    %103 = arith.mulf %96, %36 : vector<8x128xf32>
    %104 = arith.mulf %25, %36 : vector<8x128xf32>
    %105 = arith.addf %103, %104 : vector<8x128xf32>
    %106 = arith.mulf %27, %39 : vector<8x128xf32>
    %107 = arith.addf %105, %106 : vector<8x128xf32>
    %108 = arith.mulf %94, %39 : vector<8x128xf32>
    %109 = arith.mulf %27, %39 : vector<8x128xf32>
    %110 = arith.addf %108, %109 : vector<8x128xf32>
    %111 = arith.mulf %25, %36 : vector<8x128xf32>
    %112 = arith.addf %110, %111 : vector<8x128xf32>
    %113 = arith.mulf %96, %39 : vector<8x128xf32>
    %114 = arith.addf %62, %113 : vector<8x128xf32>
    %115 = arith.mulf %27, %36 : vector<8x128xf32>
    %116 = arith.addf %114, %115 : vector<8x128xf32>
    %117 = arith.mulf %29, %39 : vector<8x128xf32>
    %118 = arith.addf %116, %117 : vector<8x128xf32>
    %119 = arith.mulf %112, %107 : vector<8x128xf32>
    %120 = arith.mulf %102, %118 : vector<8x128xf32>
    %121 = arith.subf %119, %120 : vector<8x128xf32>
    %122 = math.absf %121 : vector<8x128xf32>
    %cst_14 = arith.constant 9.99999997E-7 : f32
    %123 = vector.broadcast %cst_14 : f32 to vector<8x128xf32>
    %124 = arith.cmpf ogt, %122, %123 : vector<8x128xf32>
    %cst_15 = arith.constant 1.000000e+00 : f32
    %125 = vector.broadcast %cst_15 : f32 to vector<8x128xf32>
    %126 = arith.select %124, %121, %125 : vector<8x128xi1>, vector<8x128xf32>
    %127 = tpu.reciprocal %126 {approx = true} : vector<8x128xf32> -> vector<8x128xf32>
    %cst_16 = arith.constant 0.000000e+00 : f32
    %128 = vector.broadcast %cst_16 : f32 to vector<8x128xf32>
    %129 = arith.select %124, %127, %128 : vector<8x128xi1>, vector<8x128xf32>
    %130 = arith.mulf %71, %118 : vector<8x128xf32>
    %131 = arith.mulf %79, %107 : vector<8x128xf32>
    %132 = arith.subf %130, %131 : vector<8x128xf32>
    %133 = arith.mulf %132, %129 : vector<8x128xf32>
    %134 = arith.addf %36, %133 : vector<8x128xf32>
    %135 = arith.mulf %79, %102 : vector<8x128xf32>
    %136 = arith.mulf %71, %112 : vector<8x128xf32>
    %137 = arith.subf %135, %136 : vector<8x128xf32>
    %138 = arith.mulf %137, %129 : vector<8x128xf32>
    %139 = arith.addf %39, %138 : vector<8x128xf32>
    %140 = arith.mulf %134, %134 : vector<8x128xf32>
    %141 = arith.mulf %139, %139 : vector<8x128xf32>
    %142 = arith.addf %140, %141 : vector<8x128xf32>
    %143 = arith.mulf %142, %10 : vector<8x128xf32>
    %144 = arith.addf %9, %143 : vector<8x128xf32>
    %145 = arith.mulf %142, %144 : vector<8x128xf32>
    %146 = arith.addf %8, %145 : vector<8x128xf32>
    %147 = arith.mulf %142, %146 : vector<8x128xf32>
    %cst_17 = arith.constant 1.000000e+00 : f32
    %148 = vector.broadcast %cst_17 : f32 to vector<8x128xf32>
    %149 = arith.addf %148, %147 : vector<8x128xf32>
    %150 = arith.mulf %142, %13 : vector<8x128xf32>
    %151 = arith.addf %12, %150 : vector<8x128xf32>
    %152 = arith.mulf %142, %151 : vector<8x128xf32>
    %153 = arith.addf %11, %152 : vector<8x128xf32>
    %154 = arith.mulf %142, %153 : vector<8x128xf32>
    %cst_18 = arith.constant 1.000000e+00 : f32
    %155 = vector.broadcast %cst_18 : f32 to vector<8x128xf32>
    %156 = arith.addf %155, %154 : vector<8x128xf32>
    %157 = tpu.reciprocal %156 {approx = true} : vector<8x128xf32> -> vector<8x128xf32>
    %158 = arith.mulf %156, %157 : vector<8x128xf32>
    %cst_19 = arith.constant 2.000000e+00 : f32
    %159 = vector.broadcast %cst_19 : f32 to vector<8x128xf32>
    %160 = arith.subf %159, %158 : vector<8x128xf32>
    %161 = arith.mulf %157, %160 : vector<8x128xf32>
    %162 = arith.mulf %149, %161 : vector<8x128xf32>
    %163 = arith.mulf %134, %139 : vector<8x128xf32>
    %164 = arith.mulf %162, %134 : vector<8x128xf32>
    %165 = arith.mulf %25, %163 : vector<8x128xf32>
    %166 = arith.addf %164, %165 : vector<8x128xf32>
    %167 = arith.addf %140, %140 : vector<8x128xf32>
    %168 = arith.addf %142, %167 : vector<8x128xf32>
    %169 = arith.mulf %23, %168 : vector<8x128xf32>
    %170 = arith.addf %166, %169 : vector<8x128xf32>
    %171 = arith.subf %170, %36 : vector<8x128xf32>
    %172 = arith.mulf %162, %139 : vector<8x128xf32>
    %173 = arith.mulf %27, %163 : vector<8x128xf32>
    %174 = arith.addf %172, %173 : vector<8x128xf32>
    %175 = arith.addf %141, %141 : vector<8x128xf32>
    %176 = arith.addf %142, %175 : vector<8x128xf32>
    %177 = arith.mulf %22, %176 : vector<8x128xf32>
    %178 = arith.addf %174, %177 : vector<8x128xf32>
    %179 = arith.subf %178, %39 : vector<8x128xf32>
    %180 = arith.mulf %142, %17 : vector<8x128xf32>
    %181 = arith.addf %15, %180 : vector<8x128xf32>
    %182 = arith.mulf %142, %181 : vector<8x128xf32>
    %183 = arith.addf %8, %182 : vector<8x128xf32>
    %184 = arith.mulf %142, %21 : vector<8x128xf32>
    %185 = arith.addf %19, %184 : vector<8x128xf32>
    %186 = arith.mulf %142, %185 : vector<8x128xf32>
    %187 = arith.addf %11, %186 : vector<8x128xf32>
    %188 = arith.mulf %183, %156 : vector<8x128xf32>
    %189 = arith.mulf %149, %187 : vector<8x128xf32>
    %190 = arith.subf %188, %189 : vector<8x128xf32>
    %191 = arith.mulf %161, %161 : vector<8x128xf32>
    %192 = arith.mulf %190, %191 : vector<8x128xf32>
    %193 = arith.addf %134, %134 : vector<8x128xf32>
    %194 = arith.mulf %193, %192 : vector<8x128xf32>
    %195 = arith.addf %139, %139 : vector<8x128xf32>
    %196 = arith.mulf %195, %192 : vector<8x128xf32>
    %197 = arith.mulf %194, %134 : vector<8x128xf32>
    %198 = arith.addf %162, %197 : vector<8x128xf32>
    %199 = arith.mulf %25, %139 : vector<8x128xf32>
    %200 = arith.addf %198, %199 : vector<8x128xf32>
    %201 = arith.mulf %31, %134 : vector<8x128xf32>
    %202 = arith.addf %200, %201 : vector<8x128xf32>
    %203 = arith.mulf %196, %134 : vector<8x128xf32>
    %204 = arith.mulf %25, %134 : vector<8x128xf32>
    %205 = arith.addf %203, %204 : vector<8x128xf32>
    %206 = arith.mulf %27, %139 : vector<8x128xf32>
    %207 = arith.addf %205, %206 : vector<8x128xf32>
    %208 = arith.mulf %194, %139 : vector<8x128xf32>
    %209 = arith.mulf %27, %139 : vector<8x128xf32>
    %210 = arith.addf %208, %209 : vector<8x128xf32>
    %211 = arith.mulf %25, %134 : vector<8x128xf32>
    %212 = arith.addf %210, %211 : vector<8x128xf32>
    %213 = arith.mulf %196, %139 : vector<8x128xf32>
    %214 = arith.addf %162, %213 : vector<8x128xf32>
    %215 = arith.mulf %27, %134 : vector<8x128xf32>
    %216 = arith.addf %214, %215 : vector<8x128xf32>
    %217 = arith.mulf %29, %139 : vector<8x128xf32>
    %218 = arith.addf %216, %217 : vector<8x128xf32>
    %219 = arith.mulf %212, %207 : vector<8x128xf32>
    %220 = arith.mulf %202, %218 : vector<8x128xf32>
    %221 = arith.subf %219, %220 : vector<8x128xf32>
    %222 = math.absf %221 : vector<8x128xf32>
    %cst_20 = arith.constant 9.99999997E-7 : f32
    %223 = vector.broadcast %cst_20 : f32 to vector<8x128xf32>
    %224 = arith.cmpf ogt, %222, %223 : vector<8x128xf32>
    %cst_21 = arith.constant 1.000000e+00 : f32
    %225 = vector.broadcast %cst_21 : f32 to vector<8x128xf32>
    %226 = arith.select %224, %221, %225 : vector<8x128xi1>, vector<8x128xf32>
    %227 = tpu.reciprocal %226 {approx = true} : vector<8x128xf32> -> vector<8x128xf32>
    %cst_22 = arith.constant 0.000000e+00 : f32
    %228 = vector.broadcast %cst_22 : f32 to vector<8x128xf32>
    %229 = arith.select %224, %227, %228 : vector<8x128xi1>, vector<8x128xf32>
    %230 = arith.mulf %171, %218 : vector<8x128xf32>
    %231 = arith.mulf %179, %207 : vector<8x128xf32>
    %232 = arith.subf %230, %231 : vector<8x128xf32>
    %233 = arith.mulf %232, %229 : vector<8x128xf32>
    %234 = arith.addf %134, %233 : vector<8x128xf32>
    %235 = arith.mulf %179, %202 : vector<8x128xf32>
    %236 = arith.mulf %171, %212 : vector<8x128xf32>
    %237 = arith.subf %235, %236 : vector<8x128xf32>
    %238 = arith.mulf %237, %229 : vector<8x128xf32>
    %239 = arith.addf %139, %238 : vector<8x128xf32>
    %240 = arith.mulf %234, %234 : vector<8x128xf32>
    %241 = arith.mulf %239, %239 : vector<8x128xf32>
    %242 = arith.addf %240, %241 : vector<8x128xf32>
    %243 = arith.mulf %242, %10 : vector<8x128xf32>
    %244 = arith.addf %9, %243 : vector<8x128xf32>
    %245 = arith.mulf %242, %244 : vector<8x128xf32>
    %246 = arith.addf %8, %245 : vector<8x128xf32>
    %247 = arith.mulf %242, %246 : vector<8x128xf32>
    %cst_23 = arith.constant 1.000000e+00 : f32
    %248 = vector.broadcast %cst_23 : f32 to vector<8x128xf32>
    %249 = arith.addf %248, %247 : vector<8x128xf32>
    %250 = arith.mulf %242, %13 : vector<8x128xf32>
    %251 = arith.addf %12, %250 : vector<8x128xf32>
    %252 = arith.mulf %242, %251 : vector<8x128xf32>
    %253 = arith.addf %11, %252 : vector<8x128xf32>
    %254 = arith.mulf %242, %253 : vector<8x128xf32>
    %cst_24 = arith.constant 1.000000e+00 : f32
    %255 = vector.broadcast %cst_24 : f32 to vector<8x128xf32>
    %256 = arith.addf %255, %254 : vector<8x128xf32>
    %257 = tpu.reciprocal %256 {approx = true} : vector<8x128xf32> -> vector<8x128xf32>
    %258 = arith.mulf %256, %257 : vector<8x128xf32>
    %cst_25 = arith.constant 2.000000e+00 : f32
    %259 = vector.broadcast %cst_25 : f32 to vector<8x128xf32>
    %260 = arith.subf %259, %258 : vector<8x128xf32>
    %261 = arith.mulf %257, %260 : vector<8x128xf32>
    %262 = arith.mulf %249, %261 : vector<8x128xf32>
    %263 = arith.mulf %234, %239 : vector<8x128xf32>
    %264 = arith.mulf %262, %234 : vector<8x128xf32>
    %265 = arith.mulf %25, %263 : vector<8x128xf32>
    %266 = arith.addf %264, %265 : vector<8x128xf32>
    %267 = arith.addf %240, %240 : vector<8x128xf32>
    %268 = arith.addf %242, %267 : vector<8x128xf32>
    %269 = arith.mulf %23, %268 : vector<8x128xf32>
    %270 = arith.addf %266, %269 : vector<8x128xf32>
    %271 = arith.subf %270, %36 : vector<8x128xf32>
    %272 = arith.mulf %262, %239 : vector<8x128xf32>
    %273 = arith.mulf %27, %263 : vector<8x128xf32>
    %274 = arith.addf %272, %273 : vector<8x128xf32>
    %275 = arith.addf %241, %241 : vector<8x128xf32>
    %276 = arith.addf %242, %275 : vector<8x128xf32>
    %277 = arith.mulf %22, %276 : vector<8x128xf32>
    %278 = arith.addf %274, %277 : vector<8x128xf32>
    %279 = arith.subf %278, %39 : vector<8x128xf32>
    %280 = arith.mulf %242, %17 : vector<8x128xf32>
    %281 = arith.addf %15, %280 : vector<8x128xf32>
    %282 = arith.mulf %242, %281 : vector<8x128xf32>
    %283 = arith.addf %8, %282 : vector<8x128xf32>
    %284 = arith.mulf %242, %21 : vector<8x128xf32>
    %285 = arith.addf %19, %284 : vector<8x128xf32>
    %286 = arith.mulf %242, %285 : vector<8x128xf32>
    %287 = arith.addf %11, %286 : vector<8x128xf32>
    %288 = arith.mulf %283, %256 : vector<8x128xf32>
    %289 = arith.mulf %249, %287 : vector<8x128xf32>
    %290 = arith.subf %288, %289 : vector<8x128xf32>
    %291 = arith.mulf %261, %261 : vector<8x128xf32>
    %292 = arith.mulf %290, %291 : vector<8x128xf32>
    %293 = arith.addf %234, %234 : vector<8x128xf32>
    %294 = arith.mulf %293, %292 : vector<8x128xf32>
    %295 = arith.addf %239, %239 : vector<8x128xf32>
    %296 = arith.mulf %295, %292 : vector<8x128xf32>
    %297 = arith.mulf %294, %234 : vector<8x128xf32>
    %298 = arith.addf %262, %297 : vector<8x128xf32>
    %299 = arith.mulf %25, %239 : vector<8x128xf32>
    %300 = arith.addf %298, %299 : vector<8x128xf32>
    %301 = arith.mulf %31, %234 : vector<8x128xf32>
    %302 = arith.addf %300, %301 : vector<8x128xf32>
    %303 = arith.mulf %296, %234 : vector<8x128xf32>
    %304 = arith.mulf %25, %234 : vector<8x128xf32>
    %305 = arith.addf %303, %304 : vector<8x128xf32>
    %306 = arith.mulf %27, %239 : vector<8x128xf32>
    %307 = arith.addf %305, %306 : vector<8x128xf32>
    %308 = arith.mulf %294, %239 : vector<8x128xf32>
    %309 = arith.mulf %27, %239 : vector<8x128xf32>
    %310 = arith.addf %308, %309 : vector<8x128xf32>
    %311 = arith.mulf %25, %234 : vector<8x128xf32>
    %312 = arith.addf %310, %311 : vector<8x128xf32>
    %313 = arith.mulf %296, %239 : vector<8x128xf32>
    %314 = arith.addf %262, %313 : vector<8x128xf32>
    %315 = arith.mulf %27, %234 : vector<8x128xf32>
    %316 = arith.addf %314, %315 : vector<8x128xf32>
    %317 = arith.mulf %29, %239 : vector<8x128xf32>
    %318 = arith.addf %316, %317 : vector<8x128xf32>
    %319 = arith.mulf %312, %307 : vector<8x128xf32>
    %320 = arith.mulf %302, %318 : vector<8x128xf32>
    %321 = arith.subf %319, %320 : vector<8x128xf32>
    %322 = math.absf %321 : vector<8x128xf32>
    %cst_26 = arith.constant 9.99999997E-7 : f32
    %323 = vector.broadcast %cst_26 : f32 to vector<8x128xf32>
    %324 = arith.cmpf ogt, %322, %323 : vector<8x128xf32>
    %cst_27 = arith.constant 1.000000e+00 : f32
    %325 = vector.broadcast %cst_27 : f32 to vector<8x128xf32>
    %326 = arith.select %324, %321, %325 : vector<8x128xi1>, vector<8x128xf32>
    %327 = tpu.reciprocal %326 {approx = true} : vector<8x128xf32> -> vector<8x128xf32>
    %cst_28 = arith.constant 0.000000e+00 : f32
    %328 = vector.broadcast %cst_28 : f32 to vector<8x128xf32>
    %329 = arith.select %324, %327, %328 : vector<8x128xi1>, vector<8x128xf32>
    %330 = arith.mulf %271, %318 : vector<8x128xf32>
    %331 = arith.mulf %279, %307 : vector<8x128xf32>
    %332 = arith.subf %330, %331 : vector<8x128xf32>
    %333 = arith.mulf %332, %329 : vector<8x128xf32>
    %334 = arith.addf %234, %333 : vector<8x128xf32>
    %335 = arith.mulf %279, %302 : vector<8x128xf32>
    %336 = arith.mulf %271, %312 : vector<8x128xf32>
    %337 = arith.subf %335, %336 : vector<8x128xf32>
    %338 = arith.mulf %337, %329 : vector<8x128xf32>
    %339 = arith.addf %239, %338 : vector<8x128xf32>
    %340 = arith.mulf %334, %334 : vector<8x128xf32>
    %341 = arith.mulf %339, %339 : vector<8x128xf32>
    %342 = arith.addf %340, %341 : vector<8x128xf32>
    %343 = arith.mulf %342, %10 : vector<8x128xf32>
    %344 = arith.addf %9, %343 : vector<8x128xf32>
    %345 = arith.mulf %342, %344 : vector<8x128xf32>
    %346 = arith.addf %8, %345 : vector<8x128xf32>
    %347 = arith.mulf %342, %346 : vector<8x128xf32>
    %cst_29 = arith.constant 1.000000e+00 : f32
    %348 = vector.broadcast %cst_29 : f32 to vector<8x128xf32>
    %349 = arith.addf %348, %347 : vector<8x128xf32>
    %350 = arith.mulf %342, %13 : vector<8x128xf32>
    %351 = arith.addf %12, %350 : vector<8x128xf32>
    %352 = arith.mulf %342, %351 : vector<8x128xf32>
    %353 = arith.addf %11, %352 : vector<8x128xf32>
    %354 = arith.mulf %342, %353 : vector<8x128xf32>
    %cst_30 = arith.constant 1.000000e+00 : f32
    %355 = vector.broadcast %cst_30 : f32 to vector<8x128xf32>
    %356 = arith.addf %355, %354 : vector<8x128xf32>
    %357 = tpu.reciprocal %356 {approx = true} : vector<8x128xf32> -> vector<8x128xf32>
    %358 = arith.mulf %356, %357 : vector<8x128xf32>
    %cst_31 = arith.constant 2.000000e+00 : f32
    %359 = vector.broadcast %cst_31 : f32 to vector<8x128xf32>
    %360 = arith.subf %359, %358 : vector<8x128xf32>
    %361 = arith.mulf %357, %360 : vector<8x128xf32>
    %362 = arith.mulf %349, %361 : vector<8x128xf32>
    %363 = arith.mulf %334, %339 : vector<8x128xf32>
    %364 = arith.mulf %362, %334 : vector<8x128xf32>
    %365 = arith.mulf %25, %363 : vector<8x128xf32>
    %366 = arith.addf %364, %365 : vector<8x128xf32>
    %367 = arith.addf %340, %340 : vector<8x128xf32>
    %368 = arith.addf %342, %367 : vector<8x128xf32>
    %369 = arith.mulf %23, %368 : vector<8x128xf32>
    %370 = arith.addf %366, %369 : vector<8x128xf32>
    %371 = arith.subf %370, %36 : vector<8x128xf32>
    %372 = arith.mulf %362, %339 : vector<8x128xf32>
    %373 = arith.mulf %27, %363 : vector<8x128xf32>
    %374 = arith.addf %372, %373 : vector<8x128xf32>
    %375 = arith.addf %341, %341 : vector<8x128xf32>
    %376 = arith.addf %342, %375 : vector<8x128xf32>
    %377 = arith.mulf %22, %376 : vector<8x128xf32>
    %378 = arith.addf %374, %377 : vector<8x128xf32>
    %379 = arith.subf %378, %39 : vector<8x128xf32>
    %380 = arith.mulf %342, %17 : vector<8x128xf32>
    %381 = arith.addf %15, %380 : vector<8x128xf32>
    %382 = arith.mulf %342, %381 : vector<8x128xf32>
    %383 = arith.addf %8, %382 : vector<8x128xf32>
    %384 = arith.mulf %342, %21 : vector<8x128xf32>
    %385 = arith.addf %19, %384 : vector<8x128xf32>
    %386 = arith.mulf %342, %385 : vector<8x128xf32>
    %387 = arith.addf %11, %386 : vector<8x128xf32>
    %388 = arith.mulf %383, %356 : vector<8x128xf32>
    %389 = arith.mulf %349, %387 : vector<8x128xf32>
    %390 = arith.subf %388, %389 : vector<8x128xf32>
    %391 = arith.mulf %361, %361 : vector<8x128xf32>
    %392 = arith.mulf %390, %391 : vector<8x128xf32>
    %393 = arith.addf %334, %334 : vector<8x128xf32>
    %394 = arith.mulf %393, %392 : vector<8x128xf32>
    %395 = arith.addf %339, %339 : vector<8x128xf32>
    %396 = arith.mulf %395, %392 : vector<8x128xf32>
    %397 = arith.mulf %394, %334 : vector<8x128xf32>
    %398 = arith.addf %362, %397 : vector<8x128xf32>
    %399 = arith.mulf %25, %339 : vector<8x128xf32>
    %400 = arith.addf %398, %399 : vector<8x128xf32>
    %401 = arith.mulf %31, %334 : vector<8x128xf32>
    %402 = arith.addf %400, %401 : vector<8x128xf32>
    %403 = arith.mulf %396, %334 : vector<8x128xf32>
    %404 = arith.mulf %25, %334 : vector<8x128xf32>
    %405 = arith.addf %403, %404 : vector<8x128xf32>
    %406 = arith.mulf %27, %339 : vector<8x128xf32>
    %407 = arith.addf %405, %406 : vector<8x128xf32>
    %408 = arith.mulf %394, %339 : vector<8x128xf32>
    %409 = arith.mulf %27, %339 : vector<8x128xf32>
    %410 = arith.addf %408, %409 : vector<8x128xf32>
    %411 = arith.mulf %25, %334 : vector<8x128xf32>
    %412 = arith.addf %410, %411 : vector<8x128xf32>
    %413 = arith.mulf %396, %339 : vector<8x128xf32>
    %414 = arith.addf %362, %413 : vector<8x128xf32>
    %415 = arith.mulf %27, %334 : vector<8x128xf32>
    %416 = arith.addf %414, %415 : vector<8x128xf32>
    %417 = arith.mulf %29, %339 : vector<8x128xf32>
    %418 = arith.addf %416, %417 : vector<8x128xf32>
    %419 = arith.mulf %412, %407 : vector<8x128xf32>
    %420 = arith.mulf %402, %418 : vector<8x128xf32>
    %421 = arith.subf %419, %420 : vector<8x128xf32>
    %422 = math.absf %421 : vector<8x128xf32>
    %cst_32 = arith.constant 9.99999997E-7 : f32
    %423 = vector.broadcast %cst_32 : f32 to vector<8x128xf32>
    %424 = arith.cmpf ogt, %422, %423 : vector<8x128xf32>
    %cst_33 = arith.constant 1.000000e+00 : f32
    %425 = vector.broadcast %cst_33 : f32 to vector<8x128xf32>
    %426 = arith.select %424, %421, %425 : vector<8x128xi1>, vector<8x128xf32>
    %427 = tpu.reciprocal %426 {approx = true} : vector<8x128xf32> -> vector<8x128xf32>
    %cst_34 = arith.constant 0.000000e+00 : f32
    %428 = vector.broadcast %cst_34 : f32 to vector<8x128xf32>
    %429 = arith.select %424, %427, %428 : vector<8x128xi1>, vector<8x128xf32>
    %430 = arith.mulf %371, %418 : vector<8x128xf32>
    %431 = arith.mulf %379, %407 : vector<8x128xf32>
    %432 = arith.subf %430, %431 : vector<8x128xf32>
    %433 = arith.mulf %432, %429 : vector<8x128xf32>
    %434 = arith.addf %334, %433 : vector<8x128xf32>
    %435 = arith.mulf %379, %402 : vector<8x128xf32>
    %436 = arith.mulf %371, %412 : vector<8x128xf32>
    %437 = arith.subf %435, %436 : vector<8x128xf32>
    %438 = arith.mulf %437, %429 : vector<8x128xf32>
    %439 = arith.addf %339, %438 : vector<8x128xf32>
    %440 = arith.mulf %434, %434 : vector<8x128xf32>
    %441 = arith.mulf %439, %439 : vector<8x128xf32>
    %442 = arith.addf %440, %441 : vector<8x128xf32>
    %443 = arith.mulf %442, %10 : vector<8x128xf32>
    %444 = arith.addf %9, %443 : vector<8x128xf32>
    %445 = arith.mulf %442, %444 : vector<8x128xf32>
    %446 = arith.addf %8, %445 : vector<8x128xf32>
    %447 = arith.mulf %442, %446 : vector<8x128xf32>
    %cst_35 = arith.constant 1.000000e+00 : f32
    %448 = vector.broadcast %cst_35 : f32 to vector<8x128xf32>
    %449 = arith.addf %448, %447 : vector<8x128xf32>
    %450 = arith.mulf %442, %13 : vector<8x128xf32>
    %451 = arith.addf %12, %450 : vector<8x128xf32>
    %452 = arith.mulf %442, %451 : vector<8x128xf32>
    %453 = arith.addf %11, %452 : vector<8x128xf32>
    %454 = arith.mulf %442, %453 : vector<8x128xf32>
    %cst_36 = arith.constant 1.000000e+00 : f32
    %455 = vector.broadcast %cst_36 : f32 to vector<8x128xf32>
    %456 = arith.addf %455, %454 : vector<8x128xf32>
    %457 = tpu.reciprocal %456 {approx = true} : vector<8x128xf32> -> vector<8x128xf32>
    %458 = arith.mulf %456, %457 : vector<8x128xf32>
    %cst_37 = arith.constant 2.000000e+00 : f32
    %459 = vector.broadcast %cst_37 : f32 to vector<8x128xf32>
    %460 = arith.subf %459, %458 : vector<8x128xf32>
    %461 = arith.mulf %457, %460 : vector<8x128xf32>
    %462 = arith.mulf %449, %461 : vector<8x128xf32>
    %463 = arith.mulf %434, %439 : vector<8x128xf32>
    %464 = arith.mulf %462, %434 : vector<8x128xf32>
    %465 = arith.mulf %25, %463 : vector<8x128xf32>
    %466 = arith.addf %464, %465 : vector<8x128xf32>
    %467 = arith.addf %440, %440 : vector<8x128xf32>
    %468 = arith.addf %442, %467 : vector<8x128xf32>
    %469 = arith.mulf %23, %468 : vector<8x128xf32>
    %470 = arith.addf %466, %469 : vector<8x128xf32>
    %471 = arith.subf %470, %36 : vector<8x128xf32>
    %472 = arith.mulf %462, %439 : vector<8x128xf32>
    %473 = arith.mulf %27, %463 : vector<8x128xf32>
    %474 = arith.addf %472, %473 : vector<8x128xf32>
    %475 = arith.addf %441, %441 : vector<8x128xf32>
    %476 = arith.addf %442, %475 : vector<8x128xf32>
    %477 = arith.mulf %22, %476 : vector<8x128xf32>
    %478 = arith.addf %474, %477 : vector<8x128xf32>
    %479 = arith.subf %478, %39 : vector<8x128xf32>
    %480 = arith.mulf %442, %17 : vector<8x128xf32>
    %481 = arith.addf %15, %480 : vector<8x128xf32>
    %482 = arith.mulf %442, %481 : vector<8x128xf32>
    %483 = arith.addf %8, %482 : vector<8x128xf32>
    %484 = arith.mulf %442, %21 : vector<8x128xf32>
    %485 = arith.addf %19, %484 : vector<8x128xf32>
    %486 = arith.mulf %442, %485 : vector<8x128xf32>
    %487 = arith.addf %11, %486 : vector<8x128xf32>
    %488 = arith.mulf %483, %456 : vector<8x128xf32>
    %489 = arith.mulf %449, %487 : vector<8x128xf32>
    %490 = arith.subf %488, %489 : vector<8x128xf32>
    %491 = arith.mulf %461, %461 : vector<8x128xf32>
    %492 = arith.mulf %490, %491 : vector<8x128xf32>
    %493 = arith.addf %434, %434 : vector<8x128xf32>
    %494 = arith.mulf %493, %492 : vector<8x128xf32>
    %495 = arith.addf %439, %439 : vector<8x128xf32>
    %496 = arith.mulf %495, %492 : vector<8x128xf32>
    %497 = arith.mulf %494, %434 : vector<8x128xf32>
    %498 = arith.addf %462, %497 : vector<8x128xf32>
    %499 = arith.mulf %25, %439 : vector<8x128xf32>
    %500 = arith.addf %498, %499 : vector<8x128xf32>
    %501 = arith.mulf %31, %434 : vector<8x128xf32>
    %502 = arith.addf %500, %501 : vector<8x128xf32>
    %503 = arith.mulf %496, %434 : vector<8x128xf32>
    %504 = arith.mulf %25, %434 : vector<8x128xf32>
    %505 = arith.addf %503, %504 : vector<8x128xf32>
    %506 = arith.mulf %27, %439 : vector<8x128xf32>
    %507 = arith.addf %505, %506 : vector<8x128xf32>
    %508 = arith.mulf %494, %439 : vector<8x128xf32>
    %509 = arith.mulf %27, %439 : vector<8x128xf32>
    %510 = arith.addf %508, %509 : vector<8x128xf32>
    %511 = arith.mulf %25, %434 : vector<8x128xf32>
    %512 = arith.addf %510, %511 : vector<8x128xf32>
    %513 = arith.mulf %496, %439 : vector<8x128xf32>
    %514 = arith.addf %462, %513 : vector<8x128xf32>
    %515 = arith.mulf %27, %434 : vector<8x128xf32>
    %516 = arith.addf %514, %515 : vector<8x128xf32>
    %517 = arith.mulf %29, %439 : vector<8x128xf32>
    %518 = arith.addf %516, %517 : vector<8x128xf32>
    %519 = arith.mulf %512, %507 : vector<8x128xf32>
    %520 = arith.mulf %502, %518 : vector<8x128xf32>
    %521 = arith.subf %519, %520 : vector<8x128xf32>
    %522 = math.absf %521 : vector<8x128xf32>
    %cst_38 = arith.constant 9.99999997E-7 : f32
    %523 = vector.broadcast %cst_38 : f32 to vector<8x128xf32>
    %524 = arith.cmpf ogt, %522, %523 : vector<8x128xf32>
    %cst_39 = arith.constant 1.000000e+00 : f32
    %525 = vector.broadcast %cst_39 : f32 to vector<8x128xf32>
    %526 = arith.select %524, %521, %525 : vector<8x128xi1>, vector<8x128xf32>
    %527 = tpu.reciprocal %526 {approx = true} : vector<8x128xf32> -> vector<8x128xf32>
    %cst_40 = arith.constant 0.000000e+00 : f32
    %528 = vector.broadcast %cst_40 : f32 to vector<8x128xf32>
    %529 = arith.select %524, %527, %528 : vector<8x128xi1>, vector<8x128xf32>
    %530 = arith.mulf %471, %518 : vector<8x128xf32>
    %531 = arith.mulf %479, %507 : vector<8x128xf32>
    %532 = arith.subf %530, %531 : vector<8x128xf32>
    %533 = arith.mulf %532, %529 : vector<8x128xf32>
    %534 = arith.addf %434, %533 : vector<8x128xf32>
    %535 = arith.mulf %479, %502 : vector<8x128xf32>
    %536 = arith.mulf %471, %512 : vector<8x128xf32>
    %537 = arith.subf %535, %536 : vector<8x128xf32>
    %538 = arith.mulf %537, %529 : vector<8x128xf32>
    %539 = arith.addf %439, %538 : vector<8x128xf32>
    %540 = arith.mulf %534, %534 : vector<8x128xf32>
    %541 = arith.mulf %539, %539 : vector<8x128xf32>
    %542 = arith.addf %540, %541 : vector<8x128xf32>
    %543 = arith.mulf %542, %10 : vector<8x128xf32>
    %544 = arith.addf %9, %543 : vector<8x128xf32>
    %545 = arith.mulf %542, %544 : vector<8x128xf32>
    %546 = arith.addf %8, %545 : vector<8x128xf32>
    %547 = arith.mulf %542, %546 : vector<8x128xf32>
    %cst_41 = arith.constant 1.000000e+00 : f32
    %548 = vector.broadcast %cst_41 : f32 to vector<8x128xf32>
    %549 = arith.addf %548, %547 : vector<8x128xf32>
    %550 = arith.mulf %542, %13 : vector<8x128xf32>
    %551 = arith.addf %12, %550 : vector<8x128xf32>
    %552 = arith.mulf %542, %551 : vector<8x128xf32>
    %553 = arith.addf %11, %552 : vector<8x128xf32>
    %554 = arith.mulf %542, %553 : vector<8x128xf32>
    %cst_42 = arith.constant 1.000000e+00 : f32
    %555 = vector.broadcast %cst_42 : f32 to vector<8x128xf32>
    %556 = arith.addf %555, %554 : vector<8x128xf32>
    %557 = tpu.reciprocal %556 {approx = true} : vector<8x128xf32> -> vector<8x128xf32>
    %558 = arith.mulf %556, %557 : vector<8x128xf32>
    %cst_43 = arith.constant 2.000000e+00 : f32
    %559 = vector.broadcast %cst_43 : f32 to vector<8x128xf32>
    %560 = arith.subf %559, %558 : vector<8x128xf32>
    %561 = arith.mulf %557, %560 : vector<8x128xf32>
    %562 = arith.mulf %549, %561 : vector<8x128xf32>
    %563 = arith.mulf %534, %539 : vector<8x128xf32>
    %564 = arith.mulf %562, %534 : vector<8x128xf32>
    %565 = arith.mulf %25, %563 : vector<8x128xf32>
    %566 = arith.addf %564, %565 : vector<8x128xf32>
    %567 = arith.addf %540, %540 : vector<8x128xf32>
    %568 = arith.addf %542, %567 : vector<8x128xf32>
    %569 = arith.mulf %23, %568 : vector<8x128xf32>
    %570 = arith.addf %566, %569 : vector<8x128xf32>
    %571 = arith.subf %570, %36 : vector<8x128xf32>
    %572 = arith.mulf %562, %539 : vector<8x128xf32>
    %573 = arith.mulf %27, %563 : vector<8x128xf32>
    %574 = arith.addf %572, %573 : vector<8x128xf32>
    %575 = arith.addf %541, %541 : vector<8x128xf32>
    %576 = arith.addf %542, %575 : vector<8x128xf32>
    %577 = arith.mulf %22, %576 : vector<8x128xf32>
    %578 = arith.addf %574, %577 : vector<8x128xf32>
    %579 = arith.subf %578, %39 : vector<8x128xf32>
    %580 = arith.mulf %542, %17 : vector<8x128xf32>
    %581 = arith.addf %15, %580 : vector<8x128xf32>
    %582 = arith.mulf %542, %581 : vector<8x128xf32>
    %583 = arith.addf %8, %582 : vector<8x128xf32>
    %584 = arith.mulf %542, %21 : vector<8x128xf32>
    %585 = arith.addf %19, %584 : vector<8x128xf32>
    %586 = arith.mulf %542, %585 : vector<8x128xf32>
    %587 = arith.addf %11, %586 : vector<8x128xf32>
    %588 = arith.mulf %583, %556 : vector<8x128xf32>
    %589 = arith.mulf %549, %587 : vector<8x128xf32>
    %590 = arith.subf %588, %589 : vector<8x128xf32>
    %591 = arith.mulf %561, %561 : vector<8x128xf32>
    %592 = arith.mulf %590, %591 : vector<8x128xf32>
    %593 = arith.addf %534, %534 : vector<8x128xf32>
    %594 = arith.mulf %593, %592 : vector<8x128xf32>
    %595 = arith.addf %539, %539 : vector<8x128xf32>
    %596 = arith.mulf %595, %592 : vector<8x128xf32>
    %597 = arith.mulf %594, %534 : vector<8x128xf32>
    %598 = arith.addf %562, %597 : vector<8x128xf32>
    %599 = arith.mulf %25, %539 : vector<8x128xf32>
    %600 = arith.addf %598, %599 : vector<8x128xf32>
    %601 = arith.mulf %31, %534 : vector<8x128xf32>
    %602 = arith.addf %600, %601 : vector<8x128xf32>
    %603 = arith.mulf %596, %534 : vector<8x128xf32>
    %604 = arith.mulf %25, %534 : vector<8x128xf32>
    %605 = arith.addf %603, %604 : vector<8x128xf32>
    %606 = arith.mulf %27, %539 : vector<8x128xf32>
    %607 = arith.addf %605, %606 : vector<8x128xf32>
    %608 = arith.mulf %594, %539 : vector<8x128xf32>
    %609 = arith.mulf %27, %539 : vector<8x128xf32>
    %610 = arith.addf %608, %609 : vector<8x128xf32>
    %611 = arith.mulf %25, %534 : vector<8x128xf32>
    %612 = arith.addf %610, %611 : vector<8x128xf32>
    %613 = arith.mulf %596, %539 : vector<8x128xf32>
    %614 = arith.addf %562, %613 : vector<8x128xf32>
    %615 = arith.mulf %27, %534 : vector<8x128xf32>
    %616 = arith.addf %614, %615 : vector<8x128xf32>
    %617 = arith.mulf %29, %539 : vector<8x128xf32>
    %618 = arith.addf %616, %617 : vector<8x128xf32>
    %619 = arith.mulf %612, %607 : vector<8x128xf32>
    %620 = arith.mulf %602, %618 : vector<8x128xf32>
    %621 = arith.subf %619, %620 : vector<8x128xf32>
    %622 = math.absf %621 : vector<8x128xf32>
    %cst_44 = arith.constant 9.99999997E-7 : f32
    %623 = vector.broadcast %cst_44 : f32 to vector<8x128xf32>
    %624 = arith.cmpf ogt, %622, %623 : vector<8x128xf32>
    %cst_45 = arith.constant 1.000000e+00 : f32
    %625 = vector.broadcast %cst_45 : f32 to vector<8x128xf32>
    %626 = arith.select %624, %621, %625 : vector<8x128xi1>, vector<8x128xf32>
    %627 = tpu.reciprocal %626 {approx = true} : vector<8x128xf32> -> vector<8x128xf32>
    %cst_46 = arith.constant 0.000000e+00 : f32
    %628 = vector.broadcast %cst_46 : f32 to vector<8x128xf32>
    %629 = arith.select %624, %627, %628 : vector<8x128xi1>, vector<8x128xf32>
    %630 = arith.mulf %571, %618 : vector<8x128xf32>
    %631 = arith.mulf %579, %607 : vector<8x128xf32>
    %632 = arith.subf %630, %631 : vector<8x128xf32>
    %633 = arith.mulf %632, %629 : vector<8x128xf32>
    %634 = arith.addf %534, %633 : vector<8x128xf32>
    %635 = arith.mulf %579, %602 : vector<8x128xf32>
    %636 = arith.mulf %571, %612 : vector<8x128xf32>
    %637 = arith.subf %635, %636 : vector<8x128xf32>
    %638 = arith.mulf %637, %629 : vector<8x128xf32>
    %639 = arith.addf %539, %638 : vector<8x128xf32>
    %640 = arith.mulf %634, %634 : vector<8x128xf32>
    %641 = arith.mulf %639, %639 : vector<8x128xf32>
    %642 = arith.addf %640, %641 : vector<8x128xf32>
    %643 = arith.mulf %642, %10 : vector<8x128xf32>
    %644 = arith.addf %9, %643 : vector<8x128xf32>
    %645 = arith.mulf %642, %644 : vector<8x128xf32>
    %646 = arith.addf %8, %645 : vector<8x128xf32>
    %647 = arith.mulf %642, %646 : vector<8x128xf32>
    %cst_47 = arith.constant 1.000000e+00 : f32
    %648 = vector.broadcast %cst_47 : f32 to vector<8x128xf32>
    %649 = arith.addf %648, %647 : vector<8x128xf32>
    %650 = arith.mulf %642, %13 : vector<8x128xf32>
    %651 = arith.addf %12, %650 : vector<8x128xf32>
    %652 = arith.mulf %642, %651 : vector<8x128xf32>
    %653 = arith.addf %11, %652 : vector<8x128xf32>
    %654 = arith.mulf %642, %653 : vector<8x128xf32>
    %cst_48 = arith.constant 1.000000e+00 : f32
    %655 = vector.broadcast %cst_48 : f32 to vector<8x128xf32>
    %656 = arith.addf %655, %654 : vector<8x128xf32>
    %657 = tpu.reciprocal %656 {approx = true} : vector<8x128xf32> -> vector<8x128xf32>
    %658 = arith.mulf %656, %657 : vector<8x128xf32>
    %cst_49 = arith.constant 2.000000e+00 : f32
    %659 = vector.broadcast %cst_49 : f32 to vector<8x128xf32>
    %660 = arith.subf %659, %658 : vector<8x128xf32>
    %661 = arith.mulf %657, %660 : vector<8x128xf32>
    %662 = arith.mulf %649, %661 : vector<8x128xf32>
    %663 = arith.mulf %634, %639 : vector<8x128xf32>
    %664 = arith.mulf %662, %634 : vector<8x128xf32>
    %665 = arith.mulf %25, %663 : vector<8x128xf32>
    %666 = arith.addf %664, %665 : vector<8x128xf32>
    %667 = arith.addf %640, %640 : vector<8x128xf32>
    %668 = arith.addf %642, %667 : vector<8x128xf32>
    %669 = arith.mulf %23, %668 : vector<8x128xf32>
    %670 = arith.addf %666, %669 : vector<8x128xf32>
    %671 = arith.subf %670, %36 : vector<8x128xf32>
    %672 = arith.mulf %662, %639 : vector<8x128xf32>
    %673 = arith.mulf %27, %663 : vector<8x128xf32>
    %674 = arith.addf %672, %673 : vector<8x128xf32>
    %675 = arith.addf %641, %641 : vector<8x128xf32>
    %676 = arith.addf %642, %675 : vector<8x128xf32>
    %677 = arith.mulf %22, %676 : vector<8x128xf32>
    %678 = arith.addf %674, %677 : vector<8x128xf32>
    %679 = arith.subf %678, %39 : vector<8x128xf32>
    %680 = arith.mulf %642, %17 : vector<8x128xf32>
    %681 = arith.addf %15, %680 : vector<8x128xf32>
    %682 = arith.mulf %642, %681 : vector<8x128xf32>
    %683 = arith.addf %8, %682 : vector<8x128xf32>
    %684 = arith.mulf %642, %21 : vector<8x128xf32>
    %685 = arith.addf %19, %684 : vector<8x128xf32>
    %686 = arith.mulf %642, %685 : vector<8x128xf32>
    %687 = arith.addf %11, %686 : vector<8x128xf32>
    %688 = arith.mulf %683, %656 : vector<8x128xf32>
    %689 = arith.mulf %649, %687 : vector<8x128xf32>
    %690 = arith.subf %688, %689 : vector<8x128xf32>
    %691 = arith.mulf %661, %661 : vector<8x128xf32>
    %692 = arith.mulf %690, %691 : vector<8x128xf32>
    %693 = arith.addf %634, %634 : vector<8x128xf32>
    %694 = arith.mulf %693, %692 : vector<8x128xf32>
    %695 = arith.addf %639, %639 : vector<8x128xf32>
    %696 = arith.mulf %695, %692 : vector<8x128xf32>
    %697 = arith.mulf %694, %634 : vector<8x128xf32>
    %698 = arith.addf %662, %697 : vector<8x128xf32>
    %699 = arith.mulf %25, %639 : vector<8x128xf32>
    %700 = arith.addf %698, %699 : vector<8x128xf32>
    %701 = arith.mulf %31, %634 : vector<8x128xf32>
    %702 = arith.addf %700, %701 : vector<8x128xf32>
    %703 = arith.mulf %696, %634 : vector<8x128xf32>
    %704 = arith.mulf %25, %634 : vector<8x128xf32>
    %705 = arith.addf %703, %704 : vector<8x128xf32>
    %706 = arith.mulf %27, %639 : vector<8x128xf32>
    %707 = arith.addf %705, %706 : vector<8x128xf32>
    %708 = arith.mulf %694, %639 : vector<8x128xf32>
    %709 = arith.mulf %27, %639 : vector<8x128xf32>
    %710 = arith.addf %708, %709 : vector<8x128xf32>
    %711 = arith.mulf %25, %634 : vector<8x128xf32>
    %712 = arith.addf %710, %711 : vector<8x128xf32>
    %713 = arith.mulf %696, %639 : vector<8x128xf32>
    %714 = arith.addf %662, %713 : vector<8x128xf32>
    %715 = arith.mulf %27, %634 : vector<8x128xf32>
    %716 = arith.addf %714, %715 : vector<8x128xf32>
    %717 = arith.mulf %29, %639 : vector<8x128xf32>
    %718 = arith.addf %716, %717 : vector<8x128xf32>
    %719 = arith.mulf %712, %707 : vector<8x128xf32>
    %720 = arith.mulf %702, %718 : vector<8x128xf32>
    %721 = arith.subf %719, %720 : vector<8x128xf32>
    %722 = math.absf %721 : vector<8x128xf32>
    %cst_50 = arith.constant 9.99999997E-7 : f32
    %723 = vector.broadcast %cst_50 : f32 to vector<8x128xf32>
    %724 = arith.cmpf ogt, %722, %723 : vector<8x128xf32>
    %cst_51 = arith.constant 1.000000e+00 : f32
    %725 = vector.broadcast %cst_51 : f32 to vector<8x128xf32>
    %726 = arith.select %724, %721, %725 : vector<8x128xi1>, vector<8x128xf32>
    %727 = tpu.reciprocal %726 {approx = true} : vector<8x128xf32> -> vector<8x128xf32>
    %cst_52 = arith.constant 0.000000e+00 : f32
    %728 = vector.broadcast %cst_52 : f32 to vector<8x128xf32>
    %729 = arith.select %724, %727, %728 : vector<8x128xi1>, vector<8x128xf32>
    %730 = arith.mulf %671, %718 : vector<8x128xf32>
    %731 = arith.mulf %679, %707 : vector<8x128xf32>
    %732 = arith.subf %730, %731 : vector<8x128xf32>
    %733 = arith.mulf %732, %729 : vector<8x128xf32>
    %734 = arith.addf %634, %733 : vector<8x128xf32>
    %735 = arith.mulf %679, %702 : vector<8x128xf32>
    %736 = arith.mulf %671, %712 : vector<8x128xf32>
    %737 = arith.subf %735, %736 : vector<8x128xf32>
    %738 = arith.mulf %737, %729 : vector<8x128xf32>
    %739 = arith.addf %639, %738 : vector<8x128xf32>
    %740 = arith.mulf %734, %734 : vector<8x128xf32>
    %741 = arith.mulf %739, %739 : vector<8x128xf32>
    %742 = arith.addf %740, %741 : vector<8x128xf32>
    %743 = arith.mulf %742, %10 : vector<8x128xf32>
    %744 = arith.addf %9, %743 : vector<8x128xf32>
    %745 = arith.mulf %742, %744 : vector<8x128xf32>
    %746 = arith.addf %8, %745 : vector<8x128xf32>
    %747 = arith.mulf %742, %746 : vector<8x128xf32>
    %cst_53 = arith.constant 1.000000e+00 : f32
    %748 = vector.broadcast %cst_53 : f32 to vector<8x128xf32>
    %749 = arith.addf %748, %747 : vector<8x128xf32>
    %750 = arith.mulf %742, %13 : vector<8x128xf32>
    %751 = arith.addf %12, %750 : vector<8x128xf32>
    %752 = arith.mulf %742, %751 : vector<8x128xf32>
    %753 = arith.addf %11, %752 : vector<8x128xf32>
    %754 = arith.mulf %742, %753 : vector<8x128xf32>
    %cst_54 = arith.constant 1.000000e+00 : f32
    %755 = vector.broadcast %cst_54 : f32 to vector<8x128xf32>
    %756 = arith.addf %755, %754 : vector<8x128xf32>
    %757 = tpu.reciprocal %756 {approx = true} : vector<8x128xf32> -> vector<8x128xf32>
    %758 = arith.mulf %756, %757 : vector<8x128xf32>
    %cst_55 = arith.constant 2.000000e+00 : f32
    %759 = vector.broadcast %cst_55 : f32 to vector<8x128xf32>
    %760 = arith.subf %759, %758 : vector<8x128xf32>
    %761 = arith.mulf %757, %760 : vector<8x128xf32>
    %762 = arith.mulf %749, %761 : vector<8x128xf32>
    %763 = arith.mulf %734, %739 : vector<8x128xf32>
    %764 = arith.mulf %762, %734 : vector<8x128xf32>
    %765 = arith.mulf %25, %763 : vector<8x128xf32>
    %766 = arith.addf %764, %765 : vector<8x128xf32>
    %767 = arith.addf %740, %740 : vector<8x128xf32>
    %768 = arith.addf %742, %767 : vector<8x128xf32>
    %769 = arith.mulf %23, %768 : vector<8x128xf32>
    %770 = arith.addf %766, %769 : vector<8x128xf32>
    %771 = arith.subf %770, %36 : vector<8x128xf32>
    %772 = arith.mulf %762, %739 : vector<8x128xf32>
    %773 = arith.mulf %27, %763 : vector<8x128xf32>
    %774 = arith.addf %772, %773 : vector<8x128xf32>
    %775 = arith.addf %741, %741 : vector<8x128xf32>
    %776 = arith.addf %742, %775 : vector<8x128xf32>
    %777 = arith.mulf %22, %776 : vector<8x128xf32>
    %778 = arith.addf %774, %777 : vector<8x128xf32>
    %779 = arith.subf %778, %39 : vector<8x128xf32>
    %780 = arith.mulf %742, %17 : vector<8x128xf32>
    %781 = arith.addf %15, %780 : vector<8x128xf32>
    %782 = arith.mulf %742, %781 : vector<8x128xf32>
    %783 = arith.addf %8, %782 : vector<8x128xf32>
    %784 = arith.mulf %742, %21 : vector<8x128xf32>
    %785 = arith.addf %19, %784 : vector<8x128xf32>
    %786 = arith.mulf %742, %785 : vector<8x128xf32>
    %787 = arith.addf %11, %786 : vector<8x128xf32>
    %788 = arith.mulf %783, %756 : vector<8x128xf32>
    %789 = arith.mulf %749, %787 : vector<8x128xf32>
    %790 = arith.subf %788, %789 : vector<8x128xf32>
    %791 = arith.mulf %761, %761 : vector<8x128xf32>
    %792 = arith.mulf %790, %791 : vector<8x128xf32>
    %793 = arith.addf %734, %734 : vector<8x128xf32>
    %794 = arith.mulf %793, %792 : vector<8x128xf32>
    %795 = arith.addf %739, %739 : vector<8x128xf32>
    %796 = arith.mulf %795, %792 : vector<8x128xf32>
    %797 = arith.mulf %794, %734 : vector<8x128xf32>
    %798 = arith.addf %762, %797 : vector<8x128xf32>
    %799 = arith.mulf %25, %739 : vector<8x128xf32>
    %800 = arith.addf %798, %799 : vector<8x128xf32>
    %801 = arith.mulf %31, %734 : vector<8x128xf32>
    %802 = arith.addf %800, %801 : vector<8x128xf32>
    %803 = arith.mulf %796, %734 : vector<8x128xf32>
    %804 = arith.mulf %25, %734 : vector<8x128xf32>
    %805 = arith.addf %803, %804 : vector<8x128xf32>
    %806 = arith.mulf %27, %739 : vector<8x128xf32>
    %807 = arith.addf %805, %806 : vector<8x128xf32>
    %808 = arith.mulf %794, %739 : vector<8x128xf32>
    %809 = arith.mulf %27, %739 : vector<8x128xf32>
    %810 = arith.addf %808, %809 : vector<8x128xf32>
    %811 = arith.mulf %25, %734 : vector<8x128xf32>
    %812 = arith.addf %810, %811 : vector<8x128xf32>
    %813 = arith.mulf %796, %739 : vector<8x128xf32>
    %814 = arith.addf %762, %813 : vector<8x128xf32>
    %815 = arith.mulf %27, %734 : vector<8x128xf32>
    %816 = arith.addf %814, %815 : vector<8x128xf32>
    %817 = arith.mulf %29, %739 : vector<8x128xf32>
    %818 = arith.addf %816, %817 : vector<8x128xf32>
    %819 = arith.mulf %812, %807 : vector<8x128xf32>
    %820 = arith.mulf %802, %818 : vector<8x128xf32>
    %821 = arith.subf %819, %820 : vector<8x128xf32>
    %822 = math.absf %821 : vector<8x128xf32>
    %cst_56 = arith.constant 9.99999997E-7 : f32
    %823 = vector.broadcast %cst_56 : f32 to vector<8x128xf32>
    %824 = arith.cmpf ogt, %822, %823 : vector<8x128xf32>
    %cst_57 = arith.constant 1.000000e+00 : f32
    %825 = vector.broadcast %cst_57 : f32 to vector<8x128xf32>
    %826 = arith.select %824, %821, %825 : vector<8x128xi1>, vector<8x128xf32>
    %827 = tpu.reciprocal %826 {approx = true} : vector<8x128xf32> -> vector<8x128xf32>
    %cst_58 = arith.constant 0.000000e+00 : f32
    %828 = vector.broadcast %cst_58 : f32 to vector<8x128xf32>
    %829 = arith.select %824, %827, %828 : vector<8x128xi1>, vector<8x128xf32>
    %830 = arith.mulf %771, %818 : vector<8x128xf32>
    %831 = arith.mulf %779, %807 : vector<8x128xf32>
    %832 = arith.subf %830, %831 : vector<8x128xf32>
    %833 = arith.mulf %832, %829 : vector<8x128xf32>
    %834 = arith.addf %734, %833 : vector<8x128xf32>
    %835 = arith.mulf %779, %802 : vector<8x128xf32>
    %836 = arith.mulf %771, %812 : vector<8x128xf32>
    %837 = arith.subf %835, %836 : vector<8x128xf32>
    %838 = arith.mulf %837, %829 : vector<8x128xf32>
    %839 = arith.addf %739, %838 : vector<8x128xf32>
    %840 = arith.mulf %834, %834 : vector<8x128xf32>
    %841 = arith.mulf %839, %839 : vector<8x128xf32>
    %842 = arith.addf %840, %841 : vector<8x128xf32>
    %843 = arith.mulf %842, %10 : vector<8x128xf32>
    %844 = arith.addf %9, %843 : vector<8x128xf32>
    %845 = arith.mulf %842, %844 : vector<8x128xf32>
    %846 = arith.addf %8, %845 : vector<8x128xf32>
    %847 = arith.mulf %842, %846 : vector<8x128xf32>
    %cst_59 = arith.constant 1.000000e+00 : f32
    %848 = vector.broadcast %cst_59 : f32 to vector<8x128xf32>
    %849 = arith.addf %848, %847 : vector<8x128xf32>
    %850 = arith.mulf %842, %13 : vector<8x128xf32>
    %851 = arith.addf %12, %850 : vector<8x128xf32>
    %852 = arith.mulf %842, %851 : vector<8x128xf32>
    %853 = arith.addf %11, %852 : vector<8x128xf32>
    %854 = arith.mulf %842, %853 : vector<8x128xf32>
    %cst_60 = arith.constant 1.000000e+00 : f32
    %855 = vector.broadcast %cst_60 : f32 to vector<8x128xf32>
    %856 = arith.addf %855, %854 : vector<8x128xf32>
    %857 = tpu.reciprocal %856 {approx = true} : vector<8x128xf32> -> vector<8x128xf32>
    %858 = arith.mulf %856, %857 : vector<8x128xf32>
    %cst_61 = arith.constant 2.000000e+00 : f32
    %859 = vector.broadcast %cst_61 : f32 to vector<8x128xf32>
    %860 = arith.subf %859, %858 : vector<8x128xf32>
    %861 = arith.mulf %857, %860 : vector<8x128xf32>
    %862 = arith.mulf %849, %861 : vector<8x128xf32>
    %863 = arith.mulf %834, %839 : vector<8x128xf32>
    %864 = arith.mulf %862, %834 : vector<8x128xf32>
    %865 = arith.mulf %25, %863 : vector<8x128xf32>
    %866 = arith.addf %864, %865 : vector<8x128xf32>
    %867 = arith.addf %840, %840 : vector<8x128xf32>
    %868 = arith.addf %842, %867 : vector<8x128xf32>
    %869 = arith.mulf %23, %868 : vector<8x128xf32>
    %870 = arith.addf %866, %869 : vector<8x128xf32>
    %871 = arith.subf %870, %36 : vector<8x128xf32>
    %872 = arith.mulf %862, %839 : vector<8x128xf32>
    %873 = arith.mulf %27, %863 : vector<8x128xf32>
    %874 = arith.addf %872, %873 : vector<8x128xf32>
    %875 = arith.addf %841, %841 : vector<8x128xf32>
    %876 = arith.addf %842, %875 : vector<8x128xf32>
    %877 = arith.mulf %22, %876 : vector<8x128xf32>
    %878 = arith.addf %874, %877 : vector<8x128xf32>
    %879 = arith.subf %878, %39 : vector<8x128xf32>
    %880 = arith.mulf %842, %17 : vector<8x128xf32>
    %881 = arith.addf %15, %880 : vector<8x128xf32>
    %882 = arith.mulf %842, %881 : vector<8x128xf32>
    %883 = arith.addf %8, %882 : vector<8x128xf32>
    %884 = arith.mulf %842, %21 : vector<8x128xf32>
    %885 = arith.addf %19, %884 : vector<8x128xf32>
    %886 = arith.mulf %842, %885 : vector<8x128xf32>
    %887 = arith.addf %11, %886 : vector<8x128xf32>
    %888 = arith.mulf %883, %856 : vector<8x128xf32>
    %889 = arith.mulf %849, %887 : vector<8x128xf32>
    %890 = arith.subf %888, %889 : vector<8x128xf32>
    %891 = arith.mulf %861, %861 : vector<8x128xf32>
    %892 = arith.mulf %890, %891 : vector<8x128xf32>
    %893 = arith.addf %834, %834 : vector<8x128xf32>
    %894 = arith.mulf %893, %892 : vector<8x128xf32>
    %895 = arith.addf %839, %839 : vector<8x128xf32>
    %896 = arith.mulf %895, %892 : vector<8x128xf32>
    %897 = arith.mulf %894, %834 : vector<8x128xf32>
    %898 = arith.addf %862, %897 : vector<8x128xf32>
    %899 = arith.mulf %25, %839 : vector<8x128xf32>
    %900 = arith.addf %898, %899 : vector<8x128xf32>
    %901 = arith.mulf %31, %834 : vector<8x128xf32>
    %902 = arith.addf %900, %901 : vector<8x128xf32>
    %903 = arith.mulf %896, %834 : vector<8x128xf32>
    %904 = arith.mulf %25, %834 : vector<8x128xf32>
    %905 = arith.addf %903, %904 : vector<8x128xf32>
    %906 = arith.mulf %27, %839 : vector<8x128xf32>
    %907 = arith.addf %905, %906 : vector<8x128xf32>
    %908 = arith.mulf %894, %839 : vector<8x128xf32>
    %909 = arith.mulf %27, %839 : vector<8x128xf32>
    %910 = arith.addf %908, %909 : vector<8x128xf32>
    %911 = arith.mulf %25, %834 : vector<8x128xf32>
    %912 = arith.addf %910, %911 : vector<8x128xf32>
    %913 = arith.mulf %896, %839 : vector<8x128xf32>
    %914 = arith.addf %862, %913 : vector<8x128xf32>
    %915 = arith.mulf %27, %834 : vector<8x128xf32>
    %916 = arith.addf %914, %915 : vector<8x128xf32>
    %917 = arith.mulf %29, %839 : vector<8x128xf32>
    %918 = arith.addf %916, %917 : vector<8x128xf32>
    %919 = arith.mulf %912, %907 : vector<8x128xf32>
    %920 = arith.mulf %902, %918 : vector<8x128xf32>
    %921 = arith.subf %919, %920 : vector<8x128xf32>
    %922 = math.absf %921 : vector<8x128xf32>
    %cst_62 = arith.constant 9.99999997E-7 : f32
    %923 = vector.broadcast %cst_62 : f32 to vector<8x128xf32>
    %924 = arith.cmpf ogt, %922, %923 : vector<8x128xf32>
    %cst_63 = arith.constant 1.000000e+00 : f32
    %925 = vector.broadcast %cst_63 : f32 to vector<8x128xf32>
    %926 = arith.select %924, %921, %925 : vector<8x128xi1>, vector<8x128xf32>
    %927 = tpu.reciprocal %926 {approx = true} : vector<8x128xf32> -> vector<8x128xf32>
    %cst_64 = arith.constant 0.000000e+00 : f32
    %928 = vector.broadcast %cst_64 : f32 to vector<8x128xf32>
    %929 = arith.select %924, %927, %928 : vector<8x128xi1>, vector<8x128xf32>
    %930 = arith.mulf %871, %918 : vector<8x128xf32>
    %931 = arith.mulf %879, %907 : vector<8x128xf32>
    %932 = arith.subf %930, %931 : vector<8x128xf32>
    %933 = arith.mulf %932, %929 : vector<8x128xf32>
    %934 = arith.addf %834, %933 : vector<8x128xf32>
    %935 = arith.mulf %879, %902 : vector<8x128xf32>
    %936 = arith.mulf %871, %912 : vector<8x128xf32>
    %937 = arith.subf %935, %936 : vector<8x128xf32>
    %938 = arith.mulf %937, %929 : vector<8x128xf32>
    %939 = arith.addf %839, %938 : vector<8x128xf32>
    %940 = arith.mulf %934, %934 : vector<8x128xf32>
    %941 = arith.mulf %939, %939 : vector<8x128xf32>
    %942 = arith.addf %940, %941 : vector<8x128xf32>
    %943 = arith.mulf %942, %10 : vector<8x128xf32>
    %944 = arith.addf %9, %943 : vector<8x128xf32>
    %945 = arith.mulf %942, %944 : vector<8x128xf32>
    %946 = arith.addf %8, %945 : vector<8x128xf32>
    %947 = arith.mulf %942, %946 : vector<8x128xf32>
    %cst_65 = arith.constant 1.000000e+00 : f32
    %948 = vector.broadcast %cst_65 : f32 to vector<8x128xf32>
    %949 = arith.addf %948, %947 : vector<8x128xf32>
    %950 = arith.mulf %942, %13 : vector<8x128xf32>
    %951 = arith.addf %12, %950 : vector<8x128xf32>
    %952 = arith.mulf %942, %951 : vector<8x128xf32>
    %953 = arith.addf %11, %952 : vector<8x128xf32>
    %954 = arith.mulf %942, %953 : vector<8x128xf32>
    %cst_66 = arith.constant 1.000000e+00 : f32
    %955 = vector.broadcast %cst_66 : f32 to vector<8x128xf32>
    %956 = arith.addf %955, %954 : vector<8x128xf32>
    %957 = tpu.reciprocal %956 {approx = true} : vector<8x128xf32> -> vector<8x128xf32>
    %958 = arith.mulf %956, %957 : vector<8x128xf32>
    %cst_67 = arith.constant 2.000000e+00 : f32
    %959 = vector.broadcast %cst_67 : f32 to vector<8x128xf32>
    %960 = arith.subf %959, %958 : vector<8x128xf32>
    %961 = arith.mulf %957, %960 : vector<8x128xf32>
    %962 = arith.mulf %949, %961 : vector<8x128xf32>
    %963 = arith.mulf %934, %939 : vector<8x128xf32>
    %964 = arith.mulf %962, %934 : vector<8x128xf32>
    %965 = arith.mulf %25, %963 : vector<8x128xf32>
    %966 = arith.addf %964, %965 : vector<8x128xf32>
    %967 = arith.addf %940, %940 : vector<8x128xf32>
    %968 = arith.addf %942, %967 : vector<8x128xf32>
    %969 = arith.mulf %23, %968 : vector<8x128xf32>
    %970 = arith.addf %966, %969 : vector<8x128xf32>
    %971 = arith.subf %970, %36 : vector<8x128xf32>
    %972 = arith.mulf %962, %939 : vector<8x128xf32>
    %973 = arith.mulf %27, %963 : vector<8x128xf32>
    %974 = arith.addf %972, %973 : vector<8x128xf32>
    %975 = arith.addf %941, %941 : vector<8x128xf32>
    %976 = arith.addf %942, %975 : vector<8x128xf32>
    %977 = arith.mulf %22, %976 : vector<8x128xf32>
    %978 = arith.addf %974, %977 : vector<8x128xf32>
    %979 = arith.subf %978, %39 : vector<8x128xf32>
    %980 = arith.mulf %942, %17 : vector<8x128xf32>
    %981 = arith.addf %15, %980 : vector<8x128xf32>
    %982 = arith.mulf %942, %981 : vector<8x128xf32>
    %983 = arith.addf %8, %982 : vector<8x128xf32>
    %984 = arith.mulf %942, %21 : vector<8x128xf32>
    %985 = arith.addf %19, %984 : vector<8x128xf32>
    %986 = arith.mulf %942, %985 : vector<8x128xf32>
    %987 = arith.addf %11, %986 : vector<8x128xf32>
    %988 = arith.mulf %983, %956 : vector<8x128xf32>
    %989 = arith.mulf %949, %987 : vector<8x128xf32>
    %990 = arith.subf %988, %989 : vector<8x128xf32>
    %991 = arith.mulf %961, %961 : vector<8x128xf32>
    %992 = arith.mulf %990, %991 : vector<8x128xf32>
    %993 = arith.addf %934, %934 : vector<8x128xf32>
    %994 = arith.mulf %993, %992 : vector<8x128xf32>
    %995 = arith.addf %939, %939 : vector<8x128xf32>
    %996 = arith.mulf %995, %992 : vector<8x128xf32>
    %997 = arith.mulf %994, %934 : vector<8x128xf32>
    %998 = arith.addf %962, %997 : vector<8x128xf32>
    %999 = arith.mulf %25, %939 : vector<8x128xf32>
    %1000 = arith.addf %998, %999 : vector<8x128xf32>
    %1001 = arith.mulf %31, %934 : vector<8x128xf32>
    %1002 = arith.addf %1000, %1001 : vector<8x128xf32>
    %1003 = arith.mulf %996, %934 : vector<8x128xf32>
    %1004 = arith.mulf %25, %934 : vector<8x128xf32>
    %1005 = arith.addf %1003, %1004 : vector<8x128xf32>
    %1006 = arith.mulf %27, %939 : vector<8x128xf32>
    %1007 = arith.addf %1005, %1006 : vector<8x128xf32>
    %1008 = arith.mulf %994, %939 : vector<8x128xf32>
    %1009 = arith.mulf %27, %939 : vector<8x128xf32>
    %1010 = arith.addf %1008, %1009 : vector<8x128xf32>
    %1011 = arith.mulf %25, %934 : vector<8x128xf32>
    %1012 = arith.addf %1010, %1011 : vector<8x128xf32>
    %1013 = arith.mulf %996, %939 : vector<8x128xf32>
    %1014 = arith.addf %962, %1013 : vector<8x128xf32>
    %1015 = arith.mulf %27, %934 : vector<8x128xf32>
    %1016 = arith.addf %1014, %1015 : vector<8x128xf32>
    %1017 = arith.mulf %29, %939 : vector<8x128xf32>
    %1018 = arith.addf %1016, %1017 : vector<8x128xf32>
    %1019 = arith.mulf %1012, %1007 : vector<8x128xf32>
    %1020 = arith.mulf %1002, %1018 : vector<8x128xf32>
    %1021 = arith.subf %1019, %1020 : vector<8x128xf32>
    %1022 = math.absf %1021 : vector<8x128xf32>
    %cst_68 = arith.constant 9.99999997E-7 : f32
    %1023 = vector.broadcast %cst_68 : f32 to vector<8x128xf32>
    %1024 = arith.cmpf ogt, %1022, %1023 : vector<8x128xf32>
    %cst_69 = arith.constant 1.000000e+00 : f32
    %1025 = vector.broadcast %cst_69 : f32 to vector<8x128xf32>
    %1026 = arith.select %1024, %1021, %1025 : vector<8x128xi1>, vector<8x128xf32>
    %1027 = tpu.reciprocal %1026 {approx = true} : vector<8x128xf32> -> vector<8x128xf32>
    %cst_70 = arith.constant 0.000000e+00 : f32
    %1028 = vector.broadcast %cst_70 : f32 to vector<8x128xf32>
    %1029 = arith.select %1024, %1027, %1028 : vector<8x128xi1>, vector<8x128xf32>
    %1030 = arith.mulf %971, %1018 : vector<8x128xf32>
    %1031 = arith.mulf %979, %1007 : vector<8x128xf32>
    %1032 = arith.subf %1030, %1031 : vector<8x128xf32>
    %1033 = arith.mulf %1032, %1029 : vector<8x128xf32>
    %1034 = arith.addf %934, %1033 : vector<8x128xf32>
    %1035 = arith.mulf %979, %1002 : vector<8x128xf32>
    %1036 = arith.mulf %971, %1012 : vector<8x128xf32>
    %1037 = arith.subf %1035, %1036 : vector<8x128xf32>
    %1038 = arith.mulf %1037, %1029 : vector<8x128xf32>
    %1039 = arith.addf %939, %1038 : vector<8x128xf32>
    %c0_71 = arith.constant 0 : index
    %1040 = arith.index_cast %33 : i32 to index
    %c0_72 = arith.constant 0 : index
    %1041 = vector.load %arg3[%c0_71, %1040, %c0_72] : memref<2x8x128xf32, #tpu.memory_space<vmem>>, vector<1x8x128xf32>
    %1042 = vector.shape_cast %1041 : vector<1x8x128xf32> to vector<8x128xf32>
    %1043 = vector.shape_cast %1034 : vector<8x128xf32> to vector<1x8x128xf32>
    tpu.vector_store %arg3[%c0_71, %1040, %c0_72], %1043 {strides = array<i32>} : memref<2x8x128xf32, #tpu.memory_space<vmem>>, vector<1x8x128xf32>,
    %c1_73 = arith.constant 1 : index
    %1044 = arith.index_cast %33 : i32 to index
    %c0_74 = arith.constant 0 : index
    %1045 = vector.load %arg3[%c1_73, %1044, %c0_74] : memref<2x8x128xf32, #tpu.memory_space<vmem>>, vector<1x8x128xf32>
    %1046 = vector.shape_cast %1045 : vector<1x8x128xf32> to vector<8x128xf32>
    %1047 = vector.shape_cast %1039 : vector<8x128xf32> to vector<1x8x128xf32>
    tpu.vector_store %arg3[%c1_73, %1044, %c0_74], %1047 {strides = array<i32>} : memref<2x8x128xf32, #tpu.memory_space<vmem>>, vector<1x8x128xf32>,
    %c1_i32 = arith.constant 1 : i32
    return
  }
  func.func @transform_0(%arg0: i32) -> i32 {
    %c0_i32 = arith.constant 0 : i32
    %c0_i32_0 = arith.constant 0 : i32
    return %c0_i32 : i32
  }
  func.func @transform_1(%arg0: i32) -> (i32, i32, i32) {
    %c0_i32 = arith.constant 0 : i32
    %c0_i32_0 = arith.constant 0 : i32
    %c0_i32_1 = arith.constant 0 : i32
    return %c0_i32, %arg0, %c0_i32_0 : i32, i32, i32
  }
  func.func @transform_2(%arg0: i32) -> (i32, i32, i32) {
    %c0_i32 = arith.constant 0 : i32
    %c0_i32_0 = arith.constant 0 : i32
    %c0_i32_1 = arith.constant 0 : i32
    return %c0_i32, %arg0, %c0_i32_0 : i32, i32, i32
  }
}

</mosaic_0001>

<bundles_post_ra>
// kernel: tpu_custom_call.1
= control target key start
LH: loop header
LB: loop body
LE: loop exit
PB: predicated region body
PF: predicated region fallthrough
CT: control target
= control target key end

     0   :  { %7 = vsyncpa [#allocation5], 0  ;;  %s1776_s0 = inlined_call_operand.hbm [shape: f32[8], index: 0, kind: input, shape index: {}]   ;;  %s1777_s1 = inlined_call_operand.hbm [shape: f32[2,8,128], index: 1, kind: input, shape index: {}]   ;;  %s1778_s2 = inlined_call_operand.hbm [shape: f32[2,8,128], index: 2, kind: output, shape index: {}]  }
   0x1   :  { %8 = vsyncpa [#allocation3], 0 }
   0x2   :  { %9 = vsyncpa [#allocation4], 0  ;;  %s1070_s11 = scalar_lea.hbm %s1776_s0, 16 }
   0x3   :  { %p1071_p0 = scmp.ne.s32.totalorder %s1776_s0, %s1070_s11  ;;  %p1074_p1 = scmp.lt.u32.totalorder %s1070_s11, %s1776_s0 }
   0x5   :  { %p1076_p2 = pnand %p1074_p1, %p1071_p0 }
   0x7   :  { %1079 = shalt.err (!%p1076_p2)
}
   0x8   :  { %s1130_s16 = smov [#allocation2]   ;;  %s1131_s19 = smov [#allocation6]  }
   0x9   :  { %17 = dma.hbm_to_smem %s1776_s0, 16, %s1130_s16, [#allocation5]  }
   0xa   :  { %s23_s20 = sshll.u32 %s1131_s19, 4  ;;  %s1080_s23 = scalar_lea.hbm %s1777_s1, 256  ;;  %s24_s20 = int_to_ptr.vmem [resolvable:$true] %s23_s20 }
   0xb   :  { %p1081_p3 = scmp.ne.s32.totalorder %s1777_s1, %s1080_s23  ;;  %p1084_p4 = scmp.lt.u32.totalorder %s1080_s23, %s1777_s1 }
   0xd   :  { %p1086_p5 = pnand %p1084_p4, %p1081_p3 }
   0xf   :  { %1089 = shalt.err (!%p1086_p5)
}
  0x10   :  { %s1090_s28 = scalar_lea.vmem %s24_s20, 256  ;;  %p1095_p7 = scmp.lt.s32.totalorder %s24_s20, %s24_s20 }
  0x11   :  { %p1091_p6 = scmp.ne.s32.totalorder %s24_s20, %s1090_s28  ;;  %p1096_p8 = scmp.lt.s32.totalorder %s1090_s28, %s1090_s28 }
  0x13   :  { %p1097_p9 = por %p1096_p8, %p1095_p7 }
  0x15   :  { %p1098_p10 = pnand %p1097_p9, %p1091_p6 }
  0x17   :  { %1101 = shalt.err (!%p1098_p10)
}
  0x18   :  { %s1132_s0 = smov 128   ;;  %s1133_s29 = smov 8  }
  0x19   :  { %29 = dma.hbm_to_vmem [thread:$0]  %s1777_s1, 256, %s24_s20, [#allocation3], %s1132_s0, %s1132_s0, %s1133_s29  }
  0x1a   :  { %1124 = dma.done.wait [#allocation5], 16  }
  0x1b   :  { %1125 = vsyncadd [#allocation5], 4294967280 }
  0x1c   :  { %1126 = dma.done.wait [#allocation3], 256  }
  0x1d   :  { %1127 = vsyncadd [#allocation3], 4294967040 }
  0x1e   :  { %36 = sfence }
  0x1f   :  { %v1177_v0 = vld [vmem:[#allocation6] sm:$0xff]  ;;  %v1179_v1 = vld [vmem:[#allocation6 + $0x8] sm:$0xff]  ;;  %s1181_s4 = sld [smem:[#allocation2 + $0x1]]  ;;  %s1019_s5 = sld [smem:[#allocation2 + $0x4]] }
  0x20   :  { %v73_v2 = vmul.f32 %v1177_v0, %v1177_v0  ;;  %v74_v3 = vmul.f32 %v1179_v1, %v1179_v1  ;;  %s1021_s1 = sld [smem:[#allocation2 + $0x6]]  ;;  %s1022_s6 = sld [smem:[#allocation2 + $0x7]]  ;;  %v123_v43 = vadd.f32 %v1177_v0, %v1177_v0  ;;  %v125_v44 = vadd.f32 %v1179_v1, %v1179_v1 }
  0x21   :  { %s1020_s7 = sld [smem:[#allocation2 + $0x5]]  ;;  %s37_s9 = sld [smem:[#allocation2]]  ;;  %v93_v55 = vmul.f32 %v1179_v1, %v1177_v0 }
  0x22   :  { %v1187_v4 = vadd.f32 %v74_v3, %v73_v2  ;;  %s1231_s13 = sld [smem:[#allocation2 + $0x2]]  ;;  %s1233_s14 = sld [smem:[#allocation2 + $0x3]]  ;;  %v97_v48 = vadd.f32 %v73_v2, %v73_v2  ;;  %v105_v49 = vadd.f32 %v74_v3, %v74_v3 }
  0x23   :  { %s1134_s19 = smov [#allocation7]  }
  0x24   :  { %v98_v61 = vadd.f32 %v97_v48, %v1187_v4  ;;  %v106_v3 = vadd.f32 %v105_v49, %v1187_v4  ;;  %s1001_s20 = sshll.u32 %s1134_s19, 4  ;;  %s1002_s20 = int_to_ptr.vmem [resolvable:$true] %s1001_s20 }
  0x25   :  { %v1189_v5 = vstv %s1019_s5  ;;  %s53_s8 = smul.f32 3.0, %s1019_s5  ;;  %v1198_v9 = vstv %s1181_s4  ;;  %s1102_s21 = scalar_lea.vmem %s1002_s20, 256 }
  0x26   :  { %v1191_v6 = vstv %s1021_s1  ;;  %v1193_v7 = vstv %s1022_s6  ;;  %v76_v8 = vmul.f32 %v1187_v4, %v1189_v5  ;;  %s57_s10 = smul.f32 3.0, %s1022_s6  ;;  %p1103_p11 = scmp.ne.s32.totalorder %s1002_s20, %s1102_s21 }
  0x27   :  { %v82_v10 = vmul.f32 %v1187_v4, %v1193_v7  ;;  %v1203_v12 = vstv %s1020_s7  ;;  %s51_s11 = smul.f32 2.0, %s1181_s4  ;;  %v1207_v14 = vstv %s53_s8  ;;  %v1218_v21 = vstv %s37_s9  ;;  %p1107_p12 = scmp.lt.s32.totalorder %s1002_s20, %s1002_s20 }
  0x28   :  { %v77_v13 = vadd.f32 %v76_v8, %v1198_v9  ;;  %s55_s12 = smul.f32 2.0, %s1021_s1  ;;  %v1209_v15 = vstv %s57_s10  ;;  %v110_v19 = vmul.f32 %v1187_v4, %v1207_v14  ;;  %p1108_p13 = scmp.lt.s32.totalorder %s1102_s21, %s1102_s21 }
  0x29   :  { %v83_v11 = vadd.f32 %v82_v10, %v1191_v6  ;;  %v114_v20 = vmul.f32 %v1187_v4, %v1209_v15  ;;  %v1220_v22 = vstv %s51_s11  ;;  %s61_s15 = smul.f32 2.0, %s1231_s13 }
  0x2a   :  { %v78_v18 = vmul.f32 %v77_v13, %v1187_v4  ;;  %v1222_v23 = vstv %s55_s12  ;;  %v111_v27 = vadd.f32 %v110_v19, %v1220_v22  ;;  %s63_s16 = smul.f32 2.0, %s1233_s14  ;;  %v1272_v13 = vstv %s1233_s14  ;;  %p1109_p0 = por %p1108_p13, %p1107_p12 }
  0x2b   :  { %v84_v16 = vmul.f32 %v83_v11, %v1187_v4  ;;  %v115_v28 = vadd.f32 %v114_v20, %v1222_v23  ;;  %v1243_v45 = vstv %s61_s15  ;;  %s67_s17 = smul.f32 6.0, %s1233_s14 }
  0x2c   :  { %v79_v26 = vadd.f32 %v78_v18, %v1218_v21  ;;  %v112_v30 = vmul.f32 %v111_v27, %v1187_v4  ;;  %v1246_v46 = vstv %s63_s16  ;;  %s65_s18 = smul.f32 6.0, %s1231_s13  ;;  %v134_v53 = vmul.f32 %v1177_v0, %v1243_v45  ;;  %p1110_p1 = pnand %p1109_p0, %p1103_p11 }
  0x2d   :  { %v85_v17 = vadd.f32 %v84_v16, %v1203_v12  ;;  %v116_v31 = vmul.f32 %v115_v28, %v1187_v4  ;;  %v1251_v54 = vstv %s67_s17  ;;  %v136_v56 = vmul.f32 %v1179_v1, %v1246_v46 }
  0x2e   :  { %v80_v29 = vmul.f32 %v79_v26, %v1187_v4  ;;  %v113_v33 = vadd.f32 %v112_v30, %v1218_v21  ;;  %v1257_v57 = vstv %s65_s18  ;;  %v129_v59 = vmul.f32 %v1179_v1, %v1243_v45 }
  0x2f   :  { %v86_v24 = vmul.f32 %v85_v17, %v1187_v4  ;;  %v117_v34 = vadd.f32 %v116_v31, %v1203_v12  ;;  %v143_v2 = vmul.f32 %v1177_v0, %v1246_v46  ;;  %v131_v10 = vmul.f32 %v1177_v0, %v1251_v54 }
  0x30   :  { %v81_v32 = vadd.f32 1.0, %v80_v29  ;;  %v145_v18 = vmul.f32 %v1179_v1, %v1257_v57  ;;  %v95_v19 = vmul.f32 %v93_v55, %v1243_v45  ;;  %v103_v20 = vmul.f32 %v93_v55, %v1246_v46 }
  0x31   :  { %v87_v25 = vadd.f32 1.0, %v86_v24  ;;  %v1281_v29 = vstv %s1231_s13 }
  0x32   :  { %v119_v38 = vmul.f32 %v117_v34, %v81_v32 }
  0x33   :  { %1028 = vrcp.f32 %v87_v25  ;;  %v118_v37 = vmul.f32 %v113_v33, %v87_v25  ;;  %v99_v33 = vmul.f32 %v98_v61, %v1272_v13 }
  0x35   :  { %v120_v41 = vsub.f32 %v118_v37, %v119_v38 }
  0x3d   :  { %v1029_v35 = vpop.eup %1028 }
  0x3e   :  { %v89_v36 = vmul.f32 %v1029_v35, %v87_v25 }
  0x40   :  { %v90_v39 = vsub.f32 2.0, %v89_v36  ;;  %v107_v36 = vmul.f32 %v106_v3, %v1281_v29 }
  0x42   :  { %v91_v40 = vmul.f32 %v1029_v35, %v90_v39 }
  0x44   :  { %v121_v42 = vmul.f32 %v91_v40, %v91_v40  ;;  %v92_v50 = vmul.f32 %v91_v40, %v81_v32 }
  0x46   :  { %v122_v47 = vmul.f32 %v121_v42, %v120_v41  ;;  %v94_v4 = vmul.f32 %v92_v50, %v1177_v0  ;;  %v102_v26 = vmul.f32 %v92_v50, %v1179_v1 }
  0x48   :  { %v124_v51 = vmul.f32 %v123_v43, %v122_v47  ;;  %v126_v52 = vmul.f32 %v125_v44, %v122_v47  ;;  %v96_v34 = vadd.f32 %v95_v19, %v94_v4  ;;  %v104_v35 = vadd.f32 %v103_v20, %v102_v26 }
  0x4a   :  { %v127_v58 = vmul.f32 %v124_v51, %v1177_v0  ;;  %v133_v60 = vmul.f32 %v126_v52, %v1177_v0  ;;  %v138_v62 = vmul.f32 %v124_v51, %v1179_v1  ;;  %v141_v63 = vmul.f32 %v126_v52, %v1179_v1 }
  0x4b   :  { %v100_v39 = vadd.f32 %v99_v33, %v96_v34  ;;  %v108_v40 = vadd.f32 %v107_v36, %v104_v35 }
  0x4c   :  { %v128_v8 = vadd.f32 %v127_v58, %v92_v50  ;;  %v135_v11 = vadd.f32 %v134_v53, %v133_v60  ;;  %v139_v16 = vadd.f32 %v138_v62, %v136_v56  ;;  %v142_v17 = vadd.f32 %v141_v63, %v92_v50 }
  0x4d   :  { %v101_v43 = vsub.f32 %v100_v39, %v1177_v0  ;;  %v109_v44 = vsub.f32 %v108_v40, %v1179_v1 }
  0x4e   :  { %v130_v24 = vadd.f32 %v129_v59, %v128_v8  ;;  %v137_v25 = vadd.f32 %v136_v56, %v135_v11  ;;  %v140_v27 = vadd.f32 %v139_v16, %v134_v53  ;;  %v144_v28 = vadd.f32 %v143_v2, %v142_v17 }
  0x50   :  { %v132_v30 = vadd.f32 %v131_v10, %v130_v24  ;;  %v146_v31 = vadd.f32 %v145_v18, %v144_v28  ;;  %v147_v32 = vmul.f32 %v140_v27, %v137_v25  ;;  %v156_v48 = vmul.f32 %v137_v25, %v109_v44 }
  0x51   :  { %v161_v50 = vmul.f32 %v140_v27, %v101_v43 }
  0x52   :  { %v148_v37 = vmul.f32 %v146_v31, %v132_v30  ;;  %v155_v47 = vmul.f32 %v146_v31, %v101_v43  ;;  %v160_v49 = vmul.f32 %v132_v30, %v109_v44 }
  0x54   :  { %v149_v38 = vsub.f32 %v147_v32, %v148_v37  ;;  %v157_v51 = vsub.f32 %v155_v47, %v156_v48  ;;  %v162_v52 = vsub.f32 %v160_v49, %v161_v50 }
  0x56   :  { %v150_v41 = vand.u32 2147483647, %v149_v38 }
  0x58   :  { %vm151_vm0 = vcmp.gt.f32.partialorder %v150_v41, 1e-06 }
  0x59   :  { %v152_v42 = vsel %vm151_vm0, %v149_v38, 1.0 }
  0x5a   :  { %1030 = vrcp.f32 %v152_v42 }
  0x64   :  { %v1031_v53 = vpop.eup %1030 }
  0x65   :  { %v154_v55 = vsel %vm151_vm0, %v1031_v53, 0.0 }
  0x66   :  { %v158_v56 = vmul.f32 %v157_v51, %v154_v55  ;;  %v163_v58 = vmul.f32 %v162_v52, %v154_v55 }
  0x68   :  { %v1288_v59 = vadd.f32 %v158_v56, %v1177_v0  ;;  %v1291_v60 = vadd.f32 %v163_v58, %v1179_v1 }
  0x6a   :  { %v165_v61 = vmul.f32 %v1288_v59, %v1288_v59  ;;  %v166_v62 = vmul.f32 %v1291_v60, %v1291_v60  ;;  %v215_v42 = vadd.f32 %v1288_v59, %v1288_v59  ;;  %v217_v43 = vadd.f32 %v1291_v60, %v1291_v60 }
  0x6b   :  { %v185_v47 = vmul.f32 %v1291_v60, %v1288_v59  ;;  %v226_v51 = vmul.f32 %v1288_v59, %v1243_v45  ;;  %v221_v52 = vmul.f32 %v1291_v60, %v1243_v45  ;;  %v228_v53 = vmul.f32 %v1291_v60, %v1246_v46 }
  0x6c   :  { %v167_v63 = vadd.f32 %v166_v62, %v165_v61  ;;  %v189_v55 = vadd.f32 %v165_v61, %v165_v61  ;;  %v197_v56 = vadd.f32 %v166_v62, %v166_v62 }
  0x6d   :  { %v195_v61 = vmul.f32 %v185_v47, %v1246_v46 }
  0x6e   :  { %v168_v2 = vmul.f32 %v167_v63, %v1189_v5  ;;  %v174_v3 = vmul.f32 %v167_v63, %v1193_v7  ;;  %v202_v18 = vmul.f32 %v167_v63, %v1207_v14  ;;  %v206_v19 = vmul.f32 %v167_v63, %v1209_v15 }
  0x70   :  { %v175_v8 = vadd.f32 %v174_v3, %v1191_v6  ;;  %v169_v10 = vadd.f32 %v168_v2, %v1198_v9  ;;  %v203_v4 = vadd.f32 %v202_v18, %v1220_v22  ;;  %v207_v26 = vadd.f32 %v206_v19, %v1222_v23 }
  0x72   :  { %v176_v11 = vmul.f32 %v175_v8, %v167_v63  ;;  %v170_v17 = vmul.f32 %v169_v10, %v167_v63  ;;  %v204_v28 = vmul.f32 %v203_v4, %v167_v63  ;;  %v208_v30 = vmul.f32 %v207_v26, %v167_v63 }
  0x73   :  { %v235_v10 = vmul.f32 %v1288_v59, %v1246_v46 }
  0x74   :  { %v177_v16 = vadd.f32 %v176_v11, %v1203_v12  ;;  %v171_v25 = vadd.f32 %v170_v17, %v1218_v21  ;;  %v205_v32 = vadd.f32 %v204_v28, %v1218_v21  ;;  %v209_v33 = vadd.f32 %v208_v30, %v1203_v12 }
  0x75   :  { %v187_v11 = vmul.f32 %v185_v47, %v1243_v45  ;;  %v223_v17 = vmul.f32 %v1288_v59, %v1251_v54 }
  0x76   :  { %v178_v20 = vmul.f32 %v177_v16, %v167_v63  ;;  %v172_v27 = vmul.f32 %v171_v25, %v167_v63  ;;  %v198_v25 = vadd.f32 %v197_v56, %v167_v63 }
  0x78   :  { %v179_v24 = vadd.f32 1.0, %v178_v20  ;;  %v173_v31 = vadd.f32 1.0, %v172_v27  ;;  %v237_v20 = vmul.f32 %v1291_v60, %v1257_v57 }
  0x7a   :  { %1032 = vrcp.f32 %v179_v24  ;;  %v210_v36 = vmul.f32 %v205_v32, %v179_v24  ;;  %v211_v37 = vmul.f32 %v209_v33, %v173_v31 }
  0x7c   :  { %v212_v40 = vsub.f32 %v210_v36, %v211_v37 }
  0x84   :  { %v1033_v34 = vpop.eup %1032 }
  0x85   :  { %v181_v35 = vmul.f32 %v1033_v34, %v179_v24  ;;  %v190_v24 = vadd.f32 %v189_v55, %v167_v63 }
  0x87   :  { %v182_v38 = vsub.f32 2.0, %v181_v35  ;;  %v191_v35 = vmul.f32 %v190_v24, %v1272_v13 }
  0x89   :  { %v183_v39 = vmul.f32 %v1033_v34, %v182_v38  ;;  %v199_v38 = vmul.f32 %v198_v25, %v1281_v29 }
  0x8b   :  { %v213_v41 = vmul.f32 %v183_v39, %v183_v39  ;;  %v184_v48 = vmul.f32 %v183_v39, %v173_v31 }
  0x8d   :  { %v214_v44 = vmul.f32 %v213_v41, %v212_v40  ;;  %v186_v27 = vmul.f32 %v184_v48, %v1288_v59  ;;  %v194_v28 = vmul.f32 %v184_v48, %v1291_v60 }
  0x8f   :  { %v216_v49 = vmul.f32 %v215_v42, %v214_v44  ;;  %v218_v50 = vmul.f32 %v217_v43, %v214_v44  ;;  %v188_v36 = vadd.f32 %v187_v11, %v186_v27  ;;  %v196_v37 = vadd.f32 %v195_v61, %v194_v28 }
  0x91   :  { %v219_v58 = vmul.f32 %v216_v49, %v1288_v59  ;;  %v225_v2 = vmul.f32 %v218_v50, %v1288_v59  ;;  %v230_v3 = vmul.f32 %v216_v49, %v1291_v60  ;;  %v233_v8 = vmul.f32 %v218_v50, %v1291_v60 }
  0x92   :  { %v192_v63 = vadd.f32 %v191_v35, %v188_v36  ;;  %v200_v41 = vadd.f32 %v199_v38, %v196_v37 }
  0x93   :  { %v220_v16 = vadd.f32 %v219_v58, %v184_v48  ;;  %v227_v18 = vadd.f32 %v226_v51, %v225_v2  ;;  %v231_v62 = vadd.f32 %v230_v3, %v228_v53  ;;  %v234_v19 = vadd.f32 %v233_v8, %v184_v48 }
  0x94   :  { %v193_v44 = vsub.f32 %v192_v63, %v1177_v0  ;;  %v201_v47 = vsub.f32 %v200_v41, %v1179_v1 }
  0x95   :  { %v222_v4 = vadd.f32 %v221_v52, %v220_v16  ;;  %v229_v26 = vadd.f32 %v228_v53, %v227_v18  ;;  %v232_v30 = vadd.f32 %v231_v62, %v226_v51  ;;  %v236_v31 = vadd.f32 %v235_v10, %v234_v19 }
  0x97   :  { %v224_v32 = vadd.f32 %v223_v17, %v222_v4  ;;  %v238_v33 = vadd.f32 %v237_v20, %v236_v31  ;;  %v239_v34 = vmul.f32 %v232_v30, %v229_v26  ;;  %v248_v49 = vmul.f32 %v229_v26, %v201_v47 }
  0x98   :  { %v253_v51 = vmul.f32 %v232_v30, %v193_v44 }
  0x99   :  { %v240_v39 = vmul.f32 %v238_v33, %v224_v32  ;;  %v247_v48 = vmul.f32 %v238_v33, %v193_v44  ;;  %v252_v50 = vmul.f32 %v224_v32, %v201_v47 }
  0x9b   :  { %v241_v40 = vsub.f32 %v239_v34, %v240_v39  ;;  %v249_v52 = vsub.f32 %v247_v48, %v248_v49  ;;  %v254_v53 = vsub.f32 %v252_v50, %v253_v51 }
  0x9d   :  { %v242_v42 = vand.u32 2147483647, %v241_v40 }
  0x9f   :  { %vm243_vm1 = vcmp.gt.f32.partialorder %v242_v42, 1e-06 }
  0xa0   :  { %v244_v43 = vsel %vm243_vm1, %v241_v40, 1.0 }
  0xa1   :  { %1034 = vrcp.f32 %v244_v43 }
  0xab   :  { %v1035_v55 = vpop.eup %1034 }
  0xac   :  { %v246_v56 = vsel %vm243_vm1, %v1035_v55, 0.0 }
  0xad   :  { %v250_v58 = vmul.f32 %v249_v52, %v246_v56  ;;  %v255_v2 = vmul.f32 %v254_v53, %v246_v56 }
  0xaf   :  { %v1340_v3 = vadd.f32 %v250_v58, %v1288_v59  ;;  %v1343_v8 = vadd.f32 %v255_v2, %v1291_v60 }
  0xb1   :  { %v257_v10 = vmul.f32 %v1340_v3, %v1340_v3  ;;  %v258_v11 = vmul.f32 %v1343_v8, %v1343_v8  ;;  %v307_v43 = vadd.f32 %v1340_v3, %v1340_v3  ;;  %v309_v44 = vadd.f32 %v1343_v8, %v1343_v8 }
  0xb2   :  { %v277_v48 = vmul.f32 %v1343_v8, %v1340_v3  ;;  %v318_v52 = vmul.f32 %v1340_v3, %v1243_v45  ;;  %v313_v53 = vmul.f32 %v1343_v8, %v1243_v45  ;;  %v320_v55 = vmul.f32 %v1343_v8, %v1246_v46 }
  0xb3   :  { %v259_v16 = vadd.f32 %v258_v11, %v257_v10  ;;  %v281_v56 = vadd.f32 %v257_v10, %v257_v10  ;;  %v289_v58 = vadd.f32 %v258_v11, %v258_v11 }
  0xb4   :  { %v287_v10 = vmul.f32 %v277_v48, %v1246_v46 }
  0xb5   :  { %v260_v17 = vmul.f32 %v259_v16, %v1189_v5  ;;  %v266_v18 = vmul.f32 %v259_v16, %v1193_v7  ;;  %v294_v20 = vmul.f32 %v259_v16, %v1207_v14  ;;  %v298_v24 = vmul.f32 %v259_v16, %v1209_v15 }
  0xb7   :  { %v267_v61 = vadd.f32 %v266_v18, %v1191_v6  ;;  %v261_v62 = vadd.f32 %v260_v17, %v1198_v9  ;;  %v295_v27 = vadd.f32 %v294_v20, %v1220_v22  ;;  %v299_v28 = vadd.f32 %v298_v24, %v1222_v23 }
  0xb9   :  { %v268_v59 = vmul.f32 %v267_v61, %v259_v16  ;;  %v262_v60 = vmul.f32 %v261_v62, %v259_v16  ;;  %v296_v31 = vmul.f32 %v295_v27, %v259_v16  ;;  %v300_v32 = vmul.f32 %v299_v28, %v259_v16 }
  0xba   :  { %v327_v62 = vmul.f32 %v1340_v3, %v1246_v46 }
  0xbb   :  { %v269_v19 = vadd.f32 %v268_v59, %v1203_v12  ;;  %v263_v26 = vadd.f32 %v262_v60, %v1218_v21  ;;  %v297_v34 = vadd.f32 %v296_v31, %v1218_v21  ;;  %v301_v35 = vadd.f32 %v300_v32, %v1203_v12 }
  0xbc   :  { %v279_v59 = vmul.f32 %v277_v48, %v1243_v45  ;;  %v315_v60 = vmul.f32 %v1340_v3, %v1251_v54 }
  0xbd   :  { %v270_v25 = vmul.f32 %v269_v19, %v259_v16  ;;  %v264_v30 = vmul.f32 %v263_v26, %v259_v16  ;;  %v290_v26 = vadd.f32 %v289_v58, %v259_v16 }
  0xbf   :  { %v271_v4 = vadd.f32 1.0, %v270_v25  ;;  %v265_v33 = vadd.f32 1.0, %v264_v30  ;;  %v329_v25 = vmul.f32 %v1343_v8, %v1257_v57 }
  0xc1   :  { %1036 = vrcp.f32 %v271_v4  ;;  %v302_v38 = vmul.f32 %v297_v34, %v271_v4  ;;  %v303_v39 = vmul.f32 %v301_v35, %v265_v33 }
  0xc3   :  { %v304_v41 = vsub.f32 %v302_v38, %v303_v39 }
  0xcb   :  { %v1037_v36 = vpop.eup %1036 }
  0xcc   :  { %v273_v37 = vmul.f32 %v1037_v36, %v271_v4  ;;  %v282_v4 = vadd.f32 %v281_v56, %v259_v16 }
  0xce   :  { %v274_v40 = vsub.f32 2.0, %v273_v37  ;;  %v283_v37 = vmul.f32 %v282_v4, %v1272_v13 }
  0xd0   :  { %v275_v63 = vmul.f32 %v1037_v36, %v274_v40  ;;  %v291_v40 = vmul.f32 %v290_v26, %v1281_v29 }
  0xd2   :  { %v305_v42 = vmul.f32 %v275_v63, %v275_v63  ;;  %v276_v49 = vmul.f32 %v275_v63, %v265_v33 }
  0xd4   :  { %v306_v47 = vmul.f32 %v305_v42, %v304_v41  ;;  %v278_v30 = vmul.f32 %v276_v49, %v1340_v3  ;;  %v286_v31 = vmul.f32 %v276_v49, %v1343_v8 }
  0xd6   :  { %v308_v50 = vmul.f32 %v307_v43, %v306_v47  ;;  %v310_v51 = vmul.f32 %v309_v44, %v306_v47  ;;  %v280_v38 = vadd.f32 %v279_v59, %v278_v30  ;;  %v288_v39 = vadd.f32 %v287_v10, %v286_v31 }
  0xd8   :  { %v311_v2 = vmul.f32 %v308_v50, %v1340_v3  ;;  %v317_v17 = vmul.f32 %v310_v51, %v1340_v3  ;;  %v322_v18 = vmul.f32 %v308_v50, %v1343_v8  ;;  %v325_v61 = vmul.f32 %v310_v51, %v1343_v8 }
  0xd9   :  { %v284_v16 = vadd.f32 %v283_v37, %v280_v38  ;;  %v292_v42 = vadd.f32 %v291_v40, %v288_v39 }
  0xda   :  { %v312_v19 = vadd.f32 %v311_v2, %v276_v49  ;;  %v319_v20 = vadd.f32 %v318_v52, %v317_v17  ;;  %v323_v11 = vadd.f32 %v322_v18, %v320_v55  ;;  %v326_v24 = vadd.f32 %v325_v61, %v276_v49 }
  0xdb   :  { %v285_v47 = vsub.f32 %v284_v16, %v1177_v0  ;;  %v293_v48 = vsub.f32 %v292_v42, %v1179_v1 }
  0xdc   :  { %v314_v27 = vadd.f32 %v313_v53, %v312_v19  ;;  %v321_v28 = vadd.f32 %v320_v55, %v319_v20  ;;  %v324_v32 = vadd.f32 %v323_v11, %v318_v52  ;;  %v328_v33 = vadd.f32 %v327_v62, %v326_v24 }
  0xde   :  { %v316_v34 = vadd.f32 %v315_v60, %v314_v27  ;;  %v330_v35 = vadd.f32 %v329_v25, %v328_v33  ;;  %v331_v36 = vmul.f32 %v324_v32, %v321_v28  ;;  %v340_v50 = vmul.f32 %v321_v28, %v293_v48 }
  0xdf   :  { %v345_v52 = vmul.f32 %v324_v32, %v285_v47 }
  0xe0   :  { %v332_v63 = vmul.f32 %v330_v35, %v316_v34  ;;  %v339_v49 = vmul.f32 %v330_v35, %v285_v47  ;;  %v344_v51 = vmul.f32 %v316_v34, %v293_v48 }
  0xe2   :  { %v333_v41 = vsub.f32 %v331_v36, %v332_v63  ;;  %v341_v53 = vsub.f32 %v339_v49, %v340_v50  ;;  %v346_v55 = vsub.f32 %v344_v51, %v345_v52 }
  0xe4   :  { %v334_v43 = vand.u32 2147483647, %v333_v41 }
  0xe6   :  { %vm335_vm2 = vcmp.gt.f32.partialorder %v334_v43, 1e-06 }
  0xe7   :  { %v336_v44 = vsel %vm335_vm2, %v333_v41, 1.0 }
  0xe8   :  { %1038 = vrcp.f32 %v336_v44 }
  0xf2   :  { %v1039_v56 = vpop.eup %1038 }
  0xf3   :  { %v338_v58 = vsel %vm335_vm2, %v1039_v56, 0.0 }
  0xf4   :  { %v342_v2 = vmul.f32 %v341_v53, %v338_v58  ;;  %v347_v17 = vmul.f32 %v346_v55, %v338_v58 }
  0xf6   :  { %v1392_v18 = vadd.f32 %v342_v2, %v1340_v3  ;;  %v1395_v61 = vadd.f32 %v347_v17, %v1343_v8 }
  0xf8   :  { %v349_v62 = vmul.f32 %v1392_v18, %v1392_v18  ;;  %v350_v59 = vmul.f32 %v1395_v61, %v1395_v61  ;;  %v399_v44 = vadd.f32 %v1392_v18, %v1392_v18  ;;  %v401_v47 = vadd.f32 %v1395_v61, %v1395_v61 }
  0xf9   :  { %v369_v49 = vmul.f32 %v1395_v61, %v1392_v18  ;;  %v410_v53 = vmul.f32 %v1392_v18, %v1243_v45  ;;  %v405_v55 = vmul.f32 %v1395_v61, %v1243_v45  ;;  %v412_v56 = vmul.f32 %v1395_v61, %v1246_v46 }
  0xfa   :  { %v351_v19 = vadd.f32 %v350_v59, %v349_v62  ;;  %v373_v58 = vadd.f32 %v349_v62, %v349_v62  ;;  %v381_v2 = vadd.f32 %v350_v59, %v350_v59 }
  0xfb   :  { %v379_v62 = vmul.f32 %v369_v49, %v1246_v46 }
  0xfc   :  { %v352_v60 = vmul.f32 %v351_v19, %v1189_v5  ;;  %v358_v20 = vmul.f32 %v351_v19, %v1193_v7  ;;  %v386_v25 = vmul.f32 %v351_v19, %v1207_v14  ;;  %v390_v4 = vmul.f32 %v351_v19, %v1209_v15 }
  0xfe   :  { %v359_v10 = vadd.f32 %v358_v20, %v1191_v6  ;;  %v353_v11 = vadd.f32 %v352_v60, %v1198_v9  ;;  %v387_v30 = vadd.f32 %v386_v25, %v1220_v22  ;;  %v391_v31 = vadd.f32 %v390_v4, %v1222_v23 }
 0x100   :  { %v360_v3 = vmul.f32 %v359_v10, %v351_v19  ;;  %v354_v8 = vmul.f32 %v353_v11, %v351_v19  ;;  %v388_v33 = vmul.f32 %v387_v30, %v351_v19  ;;  %v392_v34 = vmul.f32 %v391_v31, %v351_v19 }
 0x101   :  { %v419_v11 = vmul.f32 %v1392_v18, %v1246_v46 }
 0x102   :  { %v361_v24 = vadd.f32 %v360_v3, %v1203_v12  ;;  %v355_v28 = vadd.f32 %v354_v8, %v1218_v21  ;;  %v389_v36 = vadd.f32 %v388_v33, %v1218_v21  ;;  %v393_v37 = vadd.f32 %v392_v34, %v1203_v12 }
 0x103   :  { %v371_v3 = vmul.f32 %v369_v49, %v1243_v45  ;;  %v407_v8 = vmul.f32 %v1392_v18, %v1251_v54 }
 0x104   :  { %v362_v26 = vmul.f32 %v361_v24, %v351_v19  ;;  %v356_v32 = vmul.f32 %v355_v28, %v351_v19  ;;  %v382_v28 = vadd.f32 %v381_v2, %v351_v19 }
 0x106   :  { %v363_v27 = vadd.f32 1.0, %v362_v26  ;;  %v357_v35 = vadd.f32 1.0, %v356_v32  ;;  %v421_v26 = vmul.f32 %v1395_v61, %v1257_v57 }
 0x108   :  { %1040 = vrcp.f32 %v363_v27  ;;  %v394_v40 = vmul.f32 %v389_v36, %v363_v27  ;;  %v395_v63 = vmul.f32 %v393_v37, %v357_v35 }
 0x10a   :  { %v396_v42 = vsub.f32 %v394_v40, %v395_v63 }
 0x112   :  { %v1041_v38 = vpop.eup %1040 }
 0x113   :  { %v365_v39 = vmul.f32 %v1041_v38, %v363_v27  ;;  %v374_v27 = vadd.f32 %v373_v58, %v351_v19 }
 0x115   :  { %v366_v41 = vsub.f32 2.0, %v365_v39  ;;  %v375_v39 = vmul.f32 %v374_v27, %v1272_v13 }
 0x117   :  { %v367_v16 = vmul.f32 %v1041_v38, %v366_v41  ;;  %v383_v41 = vmul.f32 %v382_v28, %v1281_v29 }
 0x119   :  { %v397_v43 = vmul.f32 %v367_v16, %v367_v16  ;;  %v368_v50 = vmul.f32 %v367_v16, %v357_v35 }
 0x11b   :  { %v398_v48 = vmul.f32 %v397_v43, %v396_v42  ;;  %v370_v32 = vmul.f32 %v368_v50, %v1392_v18  ;;  %v378_v33 = vmul.f32 %v368_v50, %v1395_v61 }
 0x11d   :  { %v400_v51 = vmul.f32 %v399_v44, %v398_v48  ;;  %v402_v52 = vmul.f32 %v401_v47, %v398_v48  ;;  %v372_v40 = vadd.f32 %v371_v3, %v370_v32  ;;  %v380_v63 = vadd.f32 %v379_v62, %v378_v33 }
 0x11f   :  { %v403_v17 = vmul.f32 %v400_v51, %v1392_v18  ;;  %v409_v60 = vmul.f32 %v402_v52, %v1392_v18  ;;  %v414_v20 = vmul.f32 %v400_v51, %v1395_v61  ;;  %v417_v10 = vmul.f32 %v402_v52, %v1395_v61 }
 0x120   :  { %v376_v19 = vadd.f32 %v375_v39, %v372_v40  ;;  %v384_v43 = vadd.f32 %v383_v41, %v380_v63 }
 0x121   :  { %v404_v24 = vadd.f32 %v403_v17, %v368_v50  ;;  %v411_v25 = vadd.f32 %v410_v53, %v409_v60  ;;  %v415_v59 = vadd.f32 %v414_v20, %v412_v56  ;;  %v418_v4 = vadd.f32 %v417_v10, %v368_v50 }
 0x122   :  { %v377_v48 = vsub.f32 %v376_v19, %v1177_v0  ;;  %v385_v49 = vsub.f32 %v384_v43, %v1179_v1 }
 0x123   :  { %v406_v30 = vadd.f32 %v405_v55, %v404_v24  ;;  %v413_v31 = vadd.f32 %v412_v56, %v411_v25  ;;  %v416_v34 = vadd.f32 %v415_v59, %v410_v53  ;;  %v420_v35 = vadd.f32 %v419_v11, %v418_v4 }
 0x125   :  { %v408_v36 = vadd.f32 %v407_v8, %v406_v30  ;;  %v422_v37 = vadd.f32 %v421_v26, %v420_v35  ;;  %v423_v38 = vmul.f32 %v416_v34, %v413_v31  ;;  %v432_v51 = vmul.f32 %v413_v31, %v385_v49 }
 0x126   :  { %v437_v53 = vmul.f32 %v416_v34, %v377_v48 }
 0x127   :  { %v424_v16 = vmul.f32 %v422_v37, %v408_v36  ;;  %v431_v50 = vmul.f32 %v422_v37, %v377_v48  ;;  %v436_v52 = vmul.f32 %v408_v36, %v385_v49 }
 0x129   :  { %v425_v42 = vsub.f32 %v423_v38, %v424_v16  ;;  %v433_v55 = vsub.f32 %v431_v50, %v432_v51  ;;  %v438_v56 = vsub.f32 %v436_v52, %v437_v53 }
 0x12b   :  { %v426_v44 = vand.u32 2147483647, %v425_v42 }
 0x12d   :  { %vm427_vm3 = vcmp.gt.f32.partialorder %v426_v44, 1e-06 }
 0x12e   :  { %v428_v47 = vsel %vm427_vm3, %v425_v42, 1.0 }
 0x12f   :  { %1042 = vrcp.f32 %v428_v47 }
 0x139   :  { %v1043_v58 = vpop.eup %1042 }
 0x13a   :  { %v430_v2 = vsel %vm427_vm3, %v1043_v58, 0.0 }
 0x13b   :  { %v434_v17 = vmul.f32 %v433_v55, %v430_v2  ;;  %v439_v60 = vmul.f32 %v438_v56, %v430_v2 }
 0x13d   :  { %v1444_v20 = vadd.f32 %v434_v17, %v1392_v18  ;;  %v1447_v10 = vadd.f32 %v439_v60, %v1395_v61 }
 0x13f   :  { %v441_v11 = vmul.f32 %v1444_v20, %v1444_v20  ;;  %v442_v3 = vmul.f32 %v1447_v10, %v1447_v10  ;;  %v491_v47 = vadd.f32 %v1444_v20, %v1444_v20  ;;  %v493_v48 = vadd.f32 %v1447_v10, %v1447_v10 }
 0x140   :  { %v461_v50 = vmul.f32 %v1447_v10, %v1444_v20  ;;  %v502_v55 = vmul.f32 %v1444_v20, %v1243_v45  ;;  %v497_v56 = vmul.f32 %v1447_v10, %v1243_v45  ;;  %v504_v58 = vmul.f32 %v1447_v10, %v1246_v46 }
 0x141   :  { %v443_v24 = vadd.f32 %v442_v3, %v441_v11  ;;  %v465_v2 = vadd.f32 %v441_v11, %v441_v11  ;;  %v473_v17 = vadd.f32 %v442_v3, %v442_v3 }
 0x142   :  { %v471_v11 = vmul.f32 %v461_v50, %v1246_v46 }
 0x143   :  { %v444_v8 = vmul.f32 %v443_v24, %v1189_v5  ;;  %v450_v25 = vmul.f32 %v443_v24, %v1193_v7  ;;  %v478_v26 = vmul.f32 %v443_v24, %v1207_v14  ;;  %v482_v27 = vmul.f32 %v443_v24, %v1209_v15 }
 0x145   :  { %v451_v62 = vadd.f32 %v450_v25, %v1191_v6  ;;  %v445_v59 = vadd.f32 %v444_v8, %v1198_v9  ;;  %v479_v32 = vadd.f32 %v478_v26, %v1220_v22  ;;  %v483_v33 = vadd.f32 %v482_v27, %v1222_v23 }
 0x147   :  { %v452_v18 = vmul.f32 %v451_v62, %v443_v24  ;;  %v446_v61 = vmul.f32 %v445_v59, %v443_v24  ;;  %v480_v35 = vmul.f32 %v479_v32, %v443_v24  ;;  %v484_v36 = vmul.f32 %v483_v33, %v443_v24 }
 0x148   :  { %v511_v59 = vmul.f32 %v1444_v20, %v1246_v46 }
 0x149   :  { %v453_v4 = vadd.f32 %v452_v18, %v1203_v12  ;;  %v447_v31 = vadd.f32 %v446_v61, %v1218_v21  ;;  %v481_v38 = vadd.f32 %v480_v35, %v1218_v21  ;;  %v485_v39 = vadd.f32 %v484_v36, %v1203_v12 }
 0x14a   :  { %v463_v18 = vmul.f32 %v461_v50, %v1243_v45  ;;  %v499_v61 = vmul.f32 %v1444_v20, %v1251_v54 }
 0x14b   :  { %v454_v28 = vmul.f32 %v453_v4, %v443_v24  ;;  %v448_v34 = vmul.f32 %v447_v31, %v443_v24  ;;  %v474_v31 = vadd.f32 %v473_v17, %v443_v24 }
 0x14d   :  { %v455_v30 = vadd.f32 1.0, %v454_v28  ;;  %v449_v37 = vadd.f32 1.0, %v448_v34  ;;  %v513_v28 = vmul.f32 %v1447_v10, %v1257_v57 }
 0x14f   :  { %1044 = vrcp.f32 %v455_v30  ;;  %v486_v41 = vmul.f32 %v481_v38, %v455_v30  ;;  %v487_v16 = vmul.f32 %v485_v39, %v449_v37 }
 0x151   :  { %v488_v43 = vsub.f32 %v486_v41, %v487_v16 }
 0x159   :  { %v1045_v40 = vpop.eup %1044 }
 0x15a   :  { %v457_v63 = vmul.f32 %v1045_v40, %v455_v30  ;;  %v466_v30 = vadd.f32 %v465_v2, %v443_v24 }
 0x15c   :  { %v458_v42 = vsub.f32 2.0, %v457_v63  ;;  %v467_v63 = vmul.f32 %v466_v30, %v1272_v13 }
 0x15e   :  { %v459_v19 = vmul.f32 %v1045_v40, %v458_v42  ;;  %v475_v42 = vmul.f32 %v474_v31, %v1281_v29 }
 0x160   :  { %v489_v44 = vmul.f32 %v459_v19, %v459_v19  ;;  %v460_v51 = vmul.f32 %v459_v19, %v449_v37 }
 0x162   :  { %v490_v49 = vmul.f32 %v489_v44, %v488_v43  ;;  %v462_v34 = vmul.f32 %v460_v51, %v1444_v20  ;;  %v470_v35 = vmul.f32 %v460_v51, %v1447_v10 }
 0x164   :  { %v492_v52 = vmul.f32 %v491_v47, %v490_v49  ;;  %v494_v53 = vmul.f32 %v493_v48, %v490_v49  ;;  %v464_v41 = vadd.f32 %v463_v18, %v462_v34  ;;  %v472_v16 = vadd.f32 %v471_v11, %v470_v35 }
 0x166   :  { %v495_v60 = vmul.f32 %v492_v52, %v1444_v20  ;;  %v501_v8 = vmul.f32 %v494_v53, %v1444_v20  ;;  %v506_v25 = vmul.f32 %v492_v52, %v1447_v10  ;;  %v509_v62 = vmul.f32 %v494_v53, %v1447_v10 }
 0x167   :  { %v468_v24 = vadd.f32 %v467_v63, %v464_v41  ;;  %v476_v44 = vadd.f32 %v475_v42, %v472_v16 }
 0x168   :  { %v496_v4 = vadd.f32 %v495_v60, %v460_v51  ;;  %v503_v26 = vadd.f32 %v502_v55, %v501_v8  ;;  %v507_v3 = vadd.f32 %v506_v25, %v504_v58  ;;  %v510_v27 = vadd.f32 %v509_v62, %v460_v51 }
 0x169   :  { %v469_v49 = vsub.f32 %v468_v24, %v1177_v0  ;;  %v477_v50 = vsub.f32 %v476_v44, %v1179_v1 }
 0x16a   :  { %v498_v32 = vadd.f32 %v497_v56, %v496_v4  ;;  %v505_v33 = vadd.f32 %v504_v58, %v503_v26  ;;  %v508_v36 = vadd.f32 %v507_v3, %v502_v55  ;;  %v512_v37 = vadd.f32 %v511_v59, %v510_v27 }
 0x16c   :  { %v500_v38 = vadd.f32 %v499_v61, %v498_v32  ;;  %v514_v39 = vadd.f32 %v513_v28, %v512_v37  ;;  %v515_v40 = vmul.f32 %v508_v36, %v505_v33  ;;  %v524_v52 = vmul.f32 %v505_v33, %v477_v50 }
 0x16d   :  { %v529_v55 = vmul.f32 %v508_v36, %v469_v49 }
 0x16e   :  { %v516_v19 = vmul.f32 %v514_v39, %v500_v38  ;;  %v523_v51 = vmul.f32 %v514_v39, %v469_v49  ;;  %v528_v53 = vmul.f32 %v500_v38, %v477_v50 }
 0x170   :  { %v517_v43 = vsub.f32 %v515_v40, %v516_v19  ;;  %v525_v56 = vsub.f32 %v523_v51, %v524_v52  ;;  %v530_v58 = vsub.f32 %v528_v53, %v529_v55 }
 0x172   :  { %v518_v47 = vand.u32 2147483647, %v517_v43 }
 0x174   :  { %vm519_vm4 = vcmp.gt.f32.partialorder %v518_v47, 1e-06 }
 0x175   :  { %v520_v48 = vsel %vm519_vm4, %v517_v43, 1.0 }
 0x176   :  { %1046 = vrcp.f32 %v520_v48 }
 0x180   :  { %v1047_v2 = vpop.eup %1046 }
 0x181   :  { %v522_v17 = vsel %vm519_vm4, %v1047_v2, 0.0 }
 0x182   :  { %v526_v60 = vmul.f32 %v525_v56, %v522_v17  ;;  %v531_v8 = vmul.f32 %v530_v58, %v522_v17 }
 0x184   :  { %v1496_v25 = vadd.f32 %v526_v60, %v1444_v20  ;;  %v1499_v62 = vadd.f32 %v531_v8, %v1447_v10 }
 0x186   :  { %v533_v0 = vmul.f32 %v1496_v25, %v1496_v25  ;;  %v534_v1 = vmul.f32 %v1499_v62, %v1499_v62  ;;  %v583_v44 = vadd.f32 %v1496_v25, %v1496_v25  ;;  %v585_v47 = vadd.f32 %v1499_v62, %v1499_v62 }
 0x187   :  { %v553_v49 = vmul.f32 %v1499_v62, %v1496_v25  ;;  %v594_v53 = vmul.f32 %v1496_v25, %v1243_v45  ;;  %v589_v55 = vmul.f32 %v1499_v62, %v1243_v45  ;;  %v596_v56 = vmul.f32 %v1499_v62, %v1246_v46 }
 0x188   :  { %v535_v59 = vadd.f32 %v534_v1, %v533_v0  ;;  %v557_v58 = vadd.f32 %v533_v0, %v533_v0  ;;  %v565_v2 = vadd.f32 %v534_v1, %v534_v1 }
 0x189   :  { %v563_v0 = vmul.f32 %v553_v49, %v1246_v46 }
 0x18a   :  { %v536_v18 = vmul.f32 %v535_v59, %v1189_v5  ;;  %v542_v4 = vmul.f32 %v535_v59, %v1193_v7  ;;  %v570_v3 = vmul.f32 %v535_v59, %v1207_v14  ;;  %v574_v27 = vmul.f32 %v535_v59, %v1209_v15 }
 0x18c   :  { %v543_v61 = vadd.f32 %v542_v4, %v1191_v6  ;;  %v537_v26 = vadd.f32 %v536_v18, %v1198_v9  ;;  %v571_v32 = vadd.f32 %v570_v3, %v1220_v22  ;;  %v575_v33 = vadd.f32 %v574_v27, %v1222_v23 }
 0x18d   :  { %v603_v4 = vmul.f32 %v1496_v25, %v1246_v46  ;;  %v605_v3 = vmul.f32 %v1499_v62, %v1257_v57  ;;  %v558_v27 = vadd.f32 %v557_v58, %v535_v59 }
 0x18e   :  { %v544_v20 = vmul.f32 %v543_v61, %v535_v59  ;;  %v538_v10 = vmul.f32 %v537_v26, %v535_v59  ;;  %v572_v35 = vmul.f32 %v571_v32, %v535_v59  ;;  %v576_v36 = vmul.f32 %v575_v33, %v535_v59 }
 0x18f   :  { %v555_v61 = vmul.f32 %v553_v49, %v1243_v45 }
 0x190   :  { %v545_v11 = vadd.f32 %v544_v20, %v1203_v12  ;;  %v539_v31 = vadd.f32 %v538_v10, %v1218_v21  ;;  %v573_v38 = vadd.f32 %v572_v35, %v1218_v21  ;;  %v577_v39 = vadd.f32 %v576_v36, %v1203_v12 }
 0x191   :  { %v591_v20 = vmul.f32 %v1496_v25, %v1251_v54 }
 0x192   :  { %v546_v28 = vmul.f32 %v545_v11, %v535_v59  ;;  %v540_v34 = vmul.f32 %v539_v31, %v535_v59 }
 0x194   :  { %v547_v30 = vadd.f32 1.0, %v546_v28  ;;  %v541_v37 = vadd.f32 1.0, %v540_v34  ;;  %v566_v28 = vadd.f32 %v565_v2, %v535_v59 }
 0x196   :  { %1048 = vrcp.f32 %v547_v30  ;;  %v578_v41 = vmul.f32 %v573_v38, %v547_v30  ;;  %v579_v16 = vmul.f32 %v577_v39, %v541_v37  ;;  %v559_v39 = vmul.f32 %v558_v27, %v1272_v13 }
 0x198   :  { %v580_v43 = vsub.f32 %v578_v41, %v579_v16  ;;  %v567_v41 = vmul.f32 %v566_v28, %v1281_v29 }
 0x1a0   :  { %v1049_v40 = vpop.eup %1048 }
 0x1a1   :  { %v549_v63 = vmul.f32 %v1049_v40, %v547_v30 }
 0x1a3   :  { %v550_v42 = vsub.f32 2.0, %v549_v63 }
 0x1a5   :  { %v551_v19 = vmul.f32 %v1049_v40, %v550_v42 }
 0x1a7   :  { %v581_v24 = vmul.f32 %v551_v19, %v551_v19  ;;  %v552_v50 = vmul.f32 %v551_v19, %v541_v37 }
 0x1a9   :  { %v582_v48 = vmul.f32 %v581_v24, %v580_v43  ;;  %v554_v32 = vmul.f32 %v552_v50, %v1496_v25  ;;  %v562_v33 = vmul.f32 %v552_v50, %v1499_v62 }
 0x1ab   :  { %v584_v51 = vmul.f32 %v583_v44, %v582_v48  ;;  %v586_v52 = vmul.f32 %v585_v47, %v582_v48  ;;  %v556_v40 = vadd.f32 %v555_v61, %v554_v32  ;;  %v564_v63 = vadd.f32 %v563_v0, %v562_v33  ;;  %v1545_v44 = vld [vmem:[#allocation6] sm:$0xff]  ;;  %v1548_v48 = vld [vmem:[#allocation6 + $0x8] sm:$0xff] }
 0x1ad   :  { %v587_v17 = vmul.f32 %v584_v51, %v1496_v25  ;;  %v593_v60 = vmul.f32 %v586_v52, %v1496_v25  ;;  %v598_v8 = vmul.f32 %v584_v51, %v1499_v62  ;;  %v601_v18 = vmul.f32 %v586_v52, %v1499_v62 }
 0x1ae   :  { %v560_v59 = vadd.f32 %v559_v39, %v556_v40  ;;  %v568_v19 = vadd.f32 %v567_v41, %v564_v63 }
 0x1af   :  { %v588_v26 = vadd.f32 %v587_v17, %v552_v50  ;;  %v595_v11 = vadd.f32 %v594_v53, %v593_v60  ;;  %v599_v1 = vadd.f32 %v598_v8, %v596_v56  ;;  %v602_v10 = vadd.f32 %v601_v18, %v552_v50 }
 0x1b0   :  { %v561_v47 = vsub.f32 %v560_v59, %v1545_v44  ;;  %v569_v49 = vsub.f32 %v568_v19, %v1548_v48 }
 0x1b1   :  { %v590_v30 = vadd.f32 %v589_v55, %v588_v26  ;;  %v597_v31 = vadd.f32 %v596_v56, %v595_v11  ;;  %v600_v34 = vadd.f32 %v599_v1, %v594_v53  ;;  %v604_v35 = vadd.f32 %v603_v4, %v602_v10 }
 0x1b3   :  { %v592_v36 = vadd.f32 %v591_v20, %v590_v30  ;;  %v606_v37 = vadd.f32 %v605_v3, %v604_v35  ;;  %v607_v38 = vmul.f32 %v600_v34, %v597_v31  ;;  %v616_v51 = vmul.f32 %v597_v31, %v569_v49 }
 0x1b4   :  { %v621_v53 = vmul.f32 %v600_v34, %v561_v47 }
 0x1b5   :  { %v608_v16 = vmul.f32 %v606_v37, %v592_v36  ;;  %v615_v50 = vmul.f32 %v606_v37, %v561_v47  ;;  %v620_v52 = vmul.f32 %v592_v36, %v569_v49 }
 0x1b7   :  { %v609_v42 = vsub.f32 %v607_v38, %v608_v16  ;;  %v617_v55 = vsub.f32 %v615_v50, %v616_v51  ;;  %v622_v56 = vsub.f32 %v620_v52, %v621_v53 }
 0x1b9   :  { %v610_v43 = vand.u32 2147483647, %v609_v42 }
 0x1bb   :  { %vm611_vm5 = vcmp.gt.f32.partialorder %v610_v43, 1e-06 }
 0x1bc   :  { %v612_v24 = vsel %vm611_vm5, %v609_v42, 1.0 }
 0x1bd   :  { %1050 = vrcp.f32 %v612_v24 }
 0x1c7   :  { %v1051_v58 = vpop.eup %1050 }
 0x1c8   :  { %v614_v2 = vsel %vm611_vm5, %v1051_v58, 0.0 }
 0x1c9   :  { %v618_v17 = vmul.f32 %v617_v55, %v614_v2  ;;  %v623_v60 = vmul.f32 %v622_v56, %v614_v2 }
 0x1cb   :  { %v1552_v8 = vadd.f32 %v618_v17, %v1496_v25  ;;  %v1555_v18 = vadd.f32 %v623_v60, %v1499_v62 }
 0x1cd   :  { %v625_v4 = vmul.f32 %v1552_v8, %v1552_v8  ;;  %v626_v61 = vmul.f32 %v1555_v18, %v1555_v18  ;;  %v675_v24 = vadd.f32 %v1552_v8, %v1552_v8  ;;  %v677_v47 = vadd.f32 %v1555_v18, %v1555_v18 }
 0x1ce   :  { %v645_v50 = vmul.f32 %v1555_v18, %v1552_v8  ;;  %v686_v55 = vmul.f32 %v1552_v8, %v1243_v45  ;;  %v681_v56 = vmul.f32 %v1555_v18, %v1243_v45  ;;  %v688_v58 = vmul.f32 %v1555_v18, %v1246_v46 }
 0x1cf   :  { %v627_v26 = vadd.f32 %v626_v61, %v625_v4  ;;  %v649_v2 = vadd.f32 %v625_v4, %v625_v4  ;;  %v657_v17 = vadd.f32 %v626_v61, %v626_v61 }
 0x1d0   :  { %v655_v4 = vmul.f32 %v645_v50, %v1246_v46 }
 0x1d1   :  { %v628_v20 = vmul.f32 %v627_v26, %v1189_v5  ;;  %v634_v11 = vmul.f32 %v627_v26, %v1193_v7  ;;  %v662_v3 = vmul.f32 %v627_v26, %v1207_v14  ;;  %v666_v27 = vmul.f32 %v627_v26, %v1209_v15 }
 0x1d3   :  { %v635_v0 = vadd.f32 %v634_v11, %v1191_v6  ;;  %v629_v1 = vadd.f32 %v628_v20, %v1198_v9  ;;  %v663_v32 = vadd.f32 %v662_v3, %v1220_v22  ;;  %v667_v33 = vadd.f32 %v666_v27, %v1222_v23 }
 0x1d5   :  { %v636_v25 = vmul.f32 %v635_v0, %v627_v26  ;;  %v630_v62 = vmul.f32 %v629_v1, %v627_v26  ;;  %v664_v35 = vmul.f32 %v663_v32, %v627_v26  ;;  %v668_v36 = vmul.f32 %v667_v33, %v627_v26 }
 0x1d6   :  { %v695_v1 = vmul.f32 %v1552_v8, %v1246_v46 }
 0x1d7   :  { %v637_v10 = vadd.f32 %v636_v25, %v1203_v12  ;;  %v631_v31 = vadd.f32 %v630_v62, %v1218_v21  ;;  %v665_v38 = vadd.f32 %v664_v35, %v1218_v21  ;;  %v669_v39 = vadd.f32 %v668_v36, %v1203_v12 }
 0x1d8   :  { %v647_v25 = vmul.f32 %v645_v50, %v1243_v45  ;;  %v683_v62 = vmul.f32 %v1552_v8, %v1251_v54 }
 0x1d9   :  { %v638_v28 = vmul.f32 %v637_v10, %v627_v26  ;;  %v632_v34 = vmul.f32 %v631_v31, %v627_v26  ;;  %v658_v31 = vadd.f32 %v657_v17, %v627_v26 }
 0x1db   :  { %v639_v30 = vadd.f32 1.0, %v638_v28  ;;  %v633_v37 = vadd.f32 1.0, %v632_v34  ;;  %v697_v28 = vmul.f32 %v1555_v18, %v1257_v57 }
 0x1dd   :  { %1052 = vrcp.f32 %v639_v30  ;;  %v670_v41 = vmul.f32 %v665_v38, %v639_v30  ;;  %v671_v16 = vmul.f32 %v669_v39, %v633_v37 }
 0x1df   :  { %v672_v19 = vsub.f32 %v670_v41, %v671_v16 }
 0x1e7   :  { %v1053_v40 = vpop.eup %1052 }
 0x1e8   :  { %v641_v63 = vmul.f32 %v1053_v40, %v639_v30  ;;  %v650_v30 = vadd.f32 %v649_v2, %v627_v26 }
 0x1ea   :  { %v642_v42 = vsub.f32 2.0, %v641_v63  ;;  %v651_v63 = vmul.f32 %v650_v30, %v1272_v13 }
 0x1ec   :  { %v643_v59 = vmul.f32 %v1053_v40, %v642_v42  ;;  %v659_v42 = vmul.f32 %v658_v31, %v1281_v29 }
 0x1ee   :  { %v673_v43 = vmul.f32 %v643_v59, %v643_v59  ;;  %v644_v51 = vmul.f32 %v643_v59, %v633_v37 }
 0x1f0   :  { %v674_v49 = vmul.f32 %v673_v43, %v672_v19  ;;  %v646_v34 = vmul.f32 %v644_v51, %v1552_v8  ;;  %v654_v35 = vmul.f32 %v644_v51, %v1555_v18 }
 0x1f2   :  { %v676_v52 = vmul.f32 %v675_v24, %v674_v49  ;;  %v678_v53 = vmul.f32 %v677_v47, %v674_v49  ;;  %v648_v41 = vadd.f32 %v647_v25, %v646_v34  ;;  %v656_v16 = vadd.f32 %v655_v4, %v654_v35 }
 0x1f4   :  { %v679_v60 = vmul.f32 %v676_v52, %v1552_v8  ;;  %v685_v20 = vmul.f32 %v678_v53, %v1552_v8  ;;  %v690_v11 = vmul.f32 %v676_v52, %v1555_v18  ;;  %v693_v0 = vmul.f32 %v678_v53, %v1555_v18 }
 0x1f5   :  { %v652_v26 = vadd.f32 %v651_v63, %v648_v41  ;;  %v660_v43 = vadd.f32 %v659_v42, %v656_v16 }
 0x1f6   :  { %v680_v10 = vadd.f32 %v679_v60, %v644_v51  ;;  %v687_v3 = vadd.f32 %v686_v55, %v685_v20  ;;  %v691_v61 = vadd.f32 %v690_v11, %v688_v58  ;;  %v694_v27 = vadd.f32 %v693_v0, %v644_v51 }
 0x1f7   :  { %v653_v49 = vsub.f32 %v652_v26, %v1545_v44  ;;  %v661_v50 = vsub.f32 %v660_v43, %v1548_v48 }
 0x1f8   :  { %v682_v32 = vadd.f32 %v681_v56, %v680_v10  ;;  %v689_v33 = vadd.f32 %v688_v58, %v687_v3  ;;  %v692_v36 = vadd.f32 %v691_v61, %v686_v55  ;;  %v696_v37 = vadd.f32 %v695_v1, %v694_v27 }
 0x1fa   :  { %v684_v38 = vadd.f32 %v683_v62, %v682_v32  ;;  %v698_v39 = vadd.f32 %v697_v28, %v696_v37  ;;  %v699_v40 = vmul.f32 %v692_v36, %v689_v33  ;;  %v708_v52 = vmul.f32 %v689_v33, %v661_v50 }
 0x1fb   :  { %v713_v55 = vmul.f32 %v692_v36, %v653_v49 }
 0x1fc   :  { %v700_v59 = vmul.f32 %v698_v39, %v684_v38  ;;  %v707_v51 = vmul.f32 %v698_v39, %v653_v49  ;;  %v712_v53 = vmul.f32 %v684_v38, %v661_v50 }
 0x1fe   :  { %v701_v19 = vsub.f32 %v699_v40, %v700_v59  ;;  %v709_v56 = vsub.f32 %v707_v51, %v708_v52  ;;  %v714_v58 = vsub.f32 %v712_v53, %v713_v55 }
 0x200   :  { %v702_v24 = vand.u32 2147483647, %v701_v19 }
 0x202   :  { %vm703_vm6 = vcmp.gt.f32.partialorder %v702_v24, 1e-06 }
 0x203   :  { %v704_v47 = vsel %vm703_vm6, %v701_v19, 1.0 }
 0x204   :  { %1054 = vrcp.f32 %v704_v47 }
 0x20e   :  { %v1055_v2 = vpop.eup %1054 }
 0x20f   :  { %v706_v17 = vsel %vm703_vm6, %v1055_v2, 0.0 }
 0x210   :  { %v710_v60 = vmul.f32 %v709_v56, %v706_v17  ;;  %v715_v20 = vmul.f32 %v714_v58, %v706_v17 }
 0x212   :  { %v1604_v11 = vadd.f32 %v710_v60, %v1552_v8  ;;  %v1607_v0 = vadd.f32 %v715_v20, %v1555_v18 }
 0x214   :  { %v717_v1 = vmul.f32 %v1604_v11, %v1604_v11  ;;  %v718_v25 = vmul.f32 %v1607_v0, %v1607_v0  ;;  %v767_v47 = vadd.f32 %v1604_v11, %v1604_v11  ;;  %v769_v49 = vadd.f32 %v1607_v0, %v1607_v0 }
 0x215   :  { %v737_v51 = vmul.f32 %v1607_v0, %v1604_v11  ;;  %v778_v56 = vmul.f32 %v1604_v11, %v1243_v45  ;;  %v773_v58 = vmul.f32 %v1607_v0, %v1243_v45  ;;  %v780_v2 = vmul.f32 %v1607_v0, %v1246_v46 }
 0x216   :  { %v719_v10 = vadd.f32 %v718_v25, %v717_v1  ;;  %v741_v17 = vadd.f32 %v717_v1, %v717_v1  ;;  %v749_v60 = vadd.f32 %v718_v25, %v718_v25 }
 0x217   :  { %v747_v1 = vmul.f32 %v737_v51, %v1246_v46 }
 0x218   :  { %v720_v62 = vmul.f32 %v719_v10, %v1189_v5  ;;  %v726_v3 = vmul.f32 %v719_v10, %v1193_v7  ;;  %v754_v28 = vmul.f32 %v719_v10, %v1207_v14  ;;  %v758_v30 = vmul.f32 %v719_v10, %v1209_v15 }
 0x21a   :  { %v727_v4 = vadd.f32 %v726_v3, %v1191_v6  ;;  %v721_v61 = vadd.f32 %v720_v62, %v1198_v9  ;;  %v755_v34 = vadd.f32 %v754_v28, %v1220_v22  ;;  %v759_v35 = vadd.f32 %v758_v30, %v1222_v23 }
 0x21c   :  { %v728_v8 = vmul.f32 %v727_v4, %v719_v10  ;;  %v722_v18 = vmul.f32 %v721_v61, %v719_v10  ;;  %v756_v37 = vmul.f32 %v755_v34, %v719_v10  ;;  %v760_v38 = vmul.f32 %v759_v35, %v719_v10 }
 0x21d   :  { %v787_v61 = vmul.f32 %v1604_v11, %v1246_v46 }
 0x21e   :  { %v729_v27 = vadd.f32 %v728_v8, %v1203_v12  ;;  %v723_v33 = vadd.f32 %v722_v18, %v1218_v21  ;;  %v757_v40 = vadd.f32 %v756_v37, %v1218_v21  ;;  %v761_v63 = vadd.f32 %v760_v38, %v1203_v12 }
 0x21f   :  { %v739_v8 = vmul.f32 %v737_v51, %v1243_v45  ;;  %v775_v18 = vmul.f32 %v1604_v11, %v1251_v54 }
 0x220   :  { %v730_v31 = vmul.f32 %v729_v27, %v719_v10  ;;  %v724_v36 = vmul.f32 %v723_v33, %v719_v10  ;;  %v750_v33 = vadd.f32 %v749_v60, %v719_v10 }
 0x222   :  { %v731_v32 = vadd.f32 1.0, %v730_v31  ;;  %v725_v39 = vadd.f32 1.0, %v724_v36  ;;  %v789_v31 = vmul.f32 %v1607_v0, %v1257_v57 }
 0x224   :  { %1056 = vrcp.f32 %v731_v32  ;;  %v762_v42 = vmul.f32 %v757_v40, %v731_v32  ;;  %v763_v59 = vmul.f32 %v761_v63, %v725_v39 }
 0x226   :  { %v764_v43 = vsub.f32 %v762_v42, %v763_v59 }
 0x22e   :  { %v1057_v41 = vpop.eup %1056 }
 0x22f   :  { %v733_v16 = vmul.f32 %v1057_v41, %v731_v32  ;;  %v742_v32 = vadd.f32 %v741_v17, %v719_v10 }
 0x231   :  { %v734_v19 = vsub.f32 2.0, %v733_v16  ;;  %v743_v16 = vmul.f32 %v742_v32, %v1272_v13 }
 0x233   :  { %v735_v26 = vmul.f32 %v1057_v41, %v734_v19  ;;  %v751_v19 = vmul.f32 %v750_v33, %v1281_v29 }
 0x235   :  { %v765_v24 = vmul.f32 %v735_v26, %v735_v26  ;;  %v736_v52 = vmul.f32 %v735_v26, %v725_v39 }
 0x237   :  { %v766_v50 = vmul.f32 %v765_v24, %v764_v43  ;;  %v738_v36 = vmul.f32 %v736_v52, %v1604_v11  ;;  %v746_v37 = vmul.f32 %v736_v52, %v1607_v0 }
 0x239   :  { %v768_v53 = vmul.f32 %v767_v47, %v766_v50  ;;  %v770_v55 = vmul.f32 %v769_v49, %v766_v50  ;;  %v740_v42 = vadd.f32 %v739_v8, %v738_v36  ;;  %v748_v59 = vadd.f32 %v747_v1, %v746_v37 }
 0x23b   :  { %v771_v20 = vmul.f32 %v768_v53, %v1604_v11  ;;  %v777_v62 = vmul.f32 %v770_v55, %v1604_v11  ;;  %v782_v3 = vmul.f32 %v768_v53, %v1607_v0  ;;  %v785_v4 = vmul.f32 %v770_v55, %v1607_v0 }
 0x23c   :  { %v744_v10 = vadd.f32 %v743_v16, %v740_v42  ;;  %v752_v24 = vadd.f32 %v751_v19, %v748_v59 }
 0x23d   :  { %v772_v27 = vadd.f32 %v771_v20, %v736_v52  ;;  %v779_v28 = vadd.f32 %v778_v56, %v777_v62  ;;  %v783_v25 = vadd.f32 %v782_v3, %v780_v2  ;;  %v786_v30 = vadd.f32 %v785_v4, %v736_v52 }
 0x23e   :  { %v745_v50 = vsub.f32 %v744_v10, %v1545_v44  ;;  %v753_v51 = vsub.f32 %v752_v24, %v1548_v48 }
 0x23f   :  { %v774_v34 = vadd.f32 %v773_v58, %v772_v27  ;;  %v781_v35 = vadd.f32 %v780_v2, %v779_v28  ;;  %v784_v38 = vadd.f32 %v783_v25, %v778_v56  ;;  %v788_v39 = vadd.f32 %v787_v61, %v786_v30 }
 0x241   :  { %v776_v40 = vadd.f32 %v775_v18, %v774_v34  ;;  %v790_v63 = vadd.f32 %v789_v31, %v788_v39  ;;  %v791_v41 = vmul.f32 %v784_v38, %v781_v35  ;;  %v800_v53 = vmul.f32 %v781_v35, %v753_v51 }
 0x242   :  { %v805_v56 = vmul.f32 %v784_v38, %v745_v50 }
 0x243   :  { %v792_v26 = vmul.f32 %v790_v63, %v776_v40  ;;  %v799_v52 = vmul.f32 %v790_v63, %v745_v50  ;;  %v804_v55 = vmul.f32 %v776_v40, %v753_v51 }
 0x245   :  { %v793_v43 = vsub.f32 %v791_v41, %v792_v26  ;;  %v801_v58 = vsub.f32 %v799_v52, %v800_v53  ;;  %v806_v2 = vsub.f32 %v804_v55, %v805_v56 }
 0x247   :  { %v794_v47 = vand.u32 2147483647, %v793_v43 }
 0x249   :  { %vm795_vm7 = vcmp.gt.f32.partialorder %v794_v47, 1e-06 }
 0x24a   :  { %v796_v49 = vsel %vm795_vm7, %v793_v43, 1.0 }
 0x24b   :  { %1058 = vrcp.f32 %v796_v49 }
 0x255   :  { %v1059_v17 = vpop.eup %1058 }
 0x256   :  { %v798_v60 = vsel %vm795_vm7, %v1059_v17, 0.0 }
 0x257   :  { %v802_v20 = vmul.f32 %v801_v58, %v798_v60  ;;  %v807_v62 = vmul.f32 %v806_v2, %v798_v60 }
 0x259   :  { %v1656_v3 = vadd.f32 %v802_v20, %v1604_v11  ;;  %v1659_v4 = vadd.f32 %v807_v62, %v1607_v0 }
 0x25b   :  { %v809_v61 = vmul.f32 %v1656_v3, %v1656_v3  ;;  %v810_v8 = vmul.f32 %v1659_v4, %v1659_v4  ;;  %v859_v49 = vadd.f32 %v1656_v3, %v1656_v3  ;;  %v861_v50 = vadd.f32 %v1659_v4, %v1659_v4 }
 0x25c   :  { %v829_v52 = vmul.f32 %v1659_v4, %v1656_v3  ;;  %v870_v58 = vmul.f32 %v1656_v3, %v1243_v45  ;;  %v865_v2 = vmul.f32 %v1659_v4, %v1243_v45  ;;  %v872_v17 = vmul.f32 %v1659_v4, %v1246_v46 }
 0x25d   :  { %v811_v27 = vadd.f32 %v810_v8, %v809_v61  ;;  %v833_v60 = vadd.f32 %v809_v61, %v809_v61  ;;  %v841_v20 = vadd.f32 %v810_v8, %v810_v8 }
 0x25e   :  { %v839_v61 = vmul.f32 %v829_v52, %v1246_v46 }
 0x25f   :  { %v812_v18 = vmul.f32 %v811_v27, %v1189_v5  ;;  %v818_v28 = vmul.f32 %v811_v27, %v1193_v7  ;;  %v846_v31 = vmul.f32 %v811_v27, %v1207_v14  ;;  %v850_v32 = vmul.f32 %v811_v27, %v1209_v15 }
 0x261   :  { %v819_v1 = vadd.f32 %v818_v28, %v1191_v6  ;;  %v813_v25 = vadd.f32 %v812_v18, %v1198_v9  ;;  %v847_v36 = vadd.f32 %v846_v31, %v1220_v22  ;;  %v851_v37 = vadd.f32 %v850_v32, %v1222_v23 }
 0x263   :  { %v820_v11 = vmul.f32 %v819_v1, %v811_v27  ;;  %v814_v0 = vmul.f32 %v813_v25, %v811_v27  ;;  %v848_v39 = vmul.f32 %v847_v36, %v811_v27  ;;  %v852_v40 = vmul.f32 %v851_v37, %v811_v27 }
 0x264   :  { %v879_v25 = vmul.f32 %v1656_v3, %v1246_v46 }
 0x265   :  { %v821_v30 = vadd.f32 %v820_v11, %v1203_v12  ;;  %v815_v35 = vadd.f32 %v814_v0, %v1218_v21  ;;  %v849_v41 = vadd.f32 %v848_v39, %v1218_v21  ;;  %v853_v16 = vadd.f32 %v852_v40, %v1203_v12 }
 0x266   :  { %v831_v11 = vmul.f32 %v829_v52, %v1243_v45  ;;  %v867_v0 = vmul.f32 %v1656_v3, %v1251_v54 }
 0x267   :  { %v822_v33 = vmul.f32 %v821_v30, %v811_v27  ;;  %v816_v38 = vmul.f32 %v815_v35, %v811_v27  ;;  %v842_v35 = vadd.f32 %v841_v20, %v811_v27 }
 0x269   :  { %v823_v34 = vadd.f32 1.0, %v822_v33  ;;  %v817_v63 = vadd.f32 1.0, %v816_v38  ;;  %v881_v33 = vmul.f32 %v1659_v4, %v1257_v57 }
 0x26b   :  { %1060 = vrcp.f32 %v823_v34  ;;  %v854_v19 = vmul.f32 %v849_v41, %v823_v34  ;;  %v855_v26 = vmul.f32 %v853_v16, %v817_v63 }
 0x26d   :  { %v856_v24 = vsub.f32 %v854_v19, %v855_v26 }
 0x275   :  { %v1061_v42 = vpop.eup %1060 }
 0x276   :  { %v825_v59 = vmul.f32 %v1061_v42, %v823_v34  ;;  %v834_v34 = vadd.f32 %v833_v60, %v811_v27 }
 0x278   :  { %v826_v43 = vsub.f32 2.0, %v825_v59  ;;  %v835_v59 = vmul.f32 %v834_v34, %v1272_v13 }
 0x27a   :  { %v827_v10 = vmul.f32 %v1061_v42, %v826_v43  ;;  %v843_v43 = vmul.f32 %v842_v35, %v1281_v29 }
 0x27c   :  { %v857_v47 = vmul.f32 %v827_v10, %v827_v10  ;;  %v828_v53 = vmul.f32 %v827_v10, %v817_v63 }
 0x27e   :  { %v858_v51 = vmul.f32 %v857_v47, %v856_v24  ;;  %v830_v38 = vmul.f32 %v828_v53, %v1656_v3  ;;  %v838_v39 = vmul.f32 %v828_v53, %v1659_v4 }
 0x280   :  { %v860_v55 = vmul.f32 %v859_v49, %v858_v51  ;;  %v862_v56 = vmul.f32 %v861_v50, %v858_v51  ;;  %v832_v19 = vadd.f32 %v831_v11, %v830_v38  ;;  %v840_v26 = vadd.f32 %v839_v61, %v838_v39 }
 0x282   :  { %v863_v62 = vmul.f32 %v860_v55, %v1656_v3  ;;  %v869_v18 = vmul.f32 %v862_v56, %v1656_v3  ;;  %v874_v28 = vmul.f32 %v860_v55, %v1659_v4  ;;  %v877_v1 = vmul.f32 %v862_v56, %v1659_v4 }
 0x283   :  { %v836_v27 = vadd.f32 %v835_v59, %v832_v19  ;;  %v844_v47 = vadd.f32 %v843_v43, %v840_v26 }
 0x284   :  { %v864_v30 = vadd.f32 %v863_v62, %v828_v53  ;;  %v871_v31 = vadd.f32 %v870_v58, %v869_v18  ;;  %v875_v8 = vadd.f32 %v874_v28, %v872_v17  ;;  %v878_v32 = vadd.f32 %v877_v1, %v828_v53 }
 0x285   :  { %v837_v51 = vsub.f32 %v836_v27, %v1545_v44  ;;  %v845_v52 = vsub.f32 %v844_v47, %v1548_v48 }
 0x286   :  { %v866_v36 = vadd.f32 %v865_v2, %v864_v30  ;;  %v873_v37 = vadd.f32 %v872_v17, %v871_v31  ;;  %v876_v40 = vadd.f32 %v875_v8, %v870_v58  ;;  %v880_v63 = vadd.f32 %v879_v25, %v878_v32 }
 0x288   :  { %v868_v41 = vadd.f32 %v867_v0, %v866_v36  ;;  %v882_v16 = vadd.f32 %v881_v33, %v880_v63  ;;  %v883_v42 = vmul.f32 %v876_v40, %v873_v37  ;;  %v892_v55 = vmul.f32 %v873_v37, %v845_v52 }
 0x289   :  { %v897_v58 = vmul.f32 %v876_v40, %v837_v51 }
 0x28a   :  { %v884_v10 = vmul.f32 %v882_v16, %v868_v41  ;;  %v891_v53 = vmul.f32 %v882_v16, %v837_v51  ;;  %v896_v56 = vmul.f32 %v868_v41, %v845_v52 }
 0x28c   :  { %v885_v24 = vsub.f32 %v883_v42, %v884_v10  ;;  %v893_v2 = vsub.f32 %v891_v53, %v892_v55  ;;  %v898_v17 = vsub.f32 %v896_v56, %v897_v58 }
 0x28e   :  { %v886_v49 = vand.u32 2147483647, %v885_v24 }
 0x290   :  { %vm887_vm8 = vcmp.gt.f32.partialorder %v886_v49, 1e-06 }
 0x291   :  { %v888_v50 = vsel %vm887_vm8, %v885_v24, 1.0 }
 0x292   :  { %1062 = vrcp.f32 %v888_v50 }
 0x29c   :  { %v1063_v60 = vpop.eup %1062 }
 0x29d   :  { %v890_v20 = vsel %vm887_vm8, %v1063_v60, 0.0 }
 0x29e   :  { %v894_v62 = vmul.f32 %v893_v2, %v890_v20  ;;  %v899_v18 = vmul.f32 %v898_v17, %v890_v20 }
 0x2a0   :  { %v1708_v28 = vadd.f32 %v894_v62, %v1656_v3  ;;  %v1711_v1 = vadd.f32 %v899_v18, %v1659_v4 }
 0x2a2   :  { %v901_v25 = vmul.f32 %v1708_v28, %v1708_v28  ;;  %v902_v11 = vmul.f32 %v1711_v1, %v1711_v1  ;;  %v962_v27 = vmul.f32 %v1708_v28, %v1243_v45  ;;  %v957_v47 = vmul.f32 %v1711_v1, %v1243_v45 }
 0x2a3   :  { %v964_v49 = vmul.f32 %v1711_v1, %v1246_v46  ;;  %v971_v58 = vmul.f32 %v1708_v28, %v1246_v46  ;;  %v959_v60 = vmul.f32 %v1708_v28, %v1251_v54 }
 0x2a4   :  { %v903_v30 = vadd.f32 %v902_v11, %v901_v25  ;;  %v925_v50 = vadd.f32 %v901_v25, %v901_v25  ;;  %v933_v51 = vadd.f32 %v902_v11, %v902_v11  ;;  %v973_v11 = vmul.f32 %v1711_v1, %v1257_v57 }
 0x2a6   :  { %v904_v0 = vmul.f32 %v903_v30, %v1189_v5  ;;  %v910_v31 = vmul.f32 %v903_v30, %v1193_v7  ;;  %v938_v33 = vmul.f32 %v903_v30, %v1207_v14  ;;  %v942_v34 = vmul.f32 %v903_v30, %v1209_v15 }
 0x2a8   :  { %v911_v61 = vadd.f32 %v910_v31, %v1191_v6  ;;  %v905_v8 = vadd.f32 %v904_v0, %v1198_v9  ;;  %v939_v5 = vadd.f32 %v938_v33, %v1220_v22  ;;  %v943_v7 = vadd.f32 %v942_v34, %v1222_v23 }
 0x2a9   :  { %v951_v22 = vadd.f32 %v1708_v28, %v1708_v28  ;;  %v953_v23 = vadd.f32 %v1711_v1, %v1711_v1  ;;  %v926_v0 = vadd.f32 %v925_v50, %v903_v30  ;;  %v934_v31 = vadd.f32 %v933_v51, %v903_v30 }
 0x2aa   :  { %v912_v3 = vmul.f32 %v911_v61, %v903_v30  ;;  %v906_v4 = vmul.f32 %v905_v8, %v903_v30  ;;  %v940_v38 = vmul.f32 %v939_v5, %v903_v30  ;;  %v944_v9 = vmul.f32 %v943_v7, %v903_v30 }
 0x2ac   :  { %v913_v32 = vadd.f32 %v912_v3, %v1203_v12  ;;  %v907_v37 = vadd.f32 %v906_v4, %v1218_v21  ;;  %v941_v40 = vadd.f32 %v940_v38, %v1218_v21  ;;  %v945_v63 = vadd.f32 %v944_v9, %v1203_v12 }
 0x2ad   :  { %v921_v21 = vmul.f32 %v1711_v1, %v1708_v28 }
 0x2ae   :  { %v914_v35 = vmul.f32 %v913_v32, %v903_v30  ;;  %v908_v6 = vmul.f32 %v907_v37, %v903_v30  ;;  %v935_v37 = vmul.f32 %v934_v31, %v1281_v29 }
 0x2af   :  { %v923_v2 = vmul.f32 %v921_v21, %v1243_v45  ;;  %v931_v62 = vmul.f32 %v921_v21, %v1246_v46  ;;  %v927_v46 = vmul.f32 %v926_v0, %v1272_v13 }
 0x2b0   :  { %v915_v36 = vadd.f32 1.0, %v914_v35  ;;  %v909_v39 = vadd.f32 1.0, %v908_v6 }
 0x2b2   :  { %1064 = vrcp.f32 %v915_v36  ;;  %v946_v15 = vmul.f32 %v941_v40, %v915_v36  ;;  %v947_v16 = vmul.f32 %v945_v63, %v909_v39 }
 0x2b4   :  { %v948_v19 = vsub.f32 %v946_v15, %v947_v16 }
 0x2bc   :  { %v1065_v14 = vpop.eup %1064 }
 0x2bd   :  { %v917_v41 = vmul.f32 %v1065_v14, %v915_v36 }
 0x2bf   :  { %v918_v42 = vsub.f32 2.0, %v917_v41 }
 0x2c1   :  { %v919_v59 = vmul.f32 %v1065_v14, %v918_v42 }
 0x2c3   :  { %v949_v26 = vmul.f32 %v919_v59, %v919_v59  ;;  %v920_v10 = vmul.f32 %v919_v59, %v909_v39 }
 0x2c5   :  { %v950_v43 = vmul.f32 %v949_v26, %v948_v19  ;;  %v922_v3 = vmul.f32 %v920_v10, %v1708_v28  ;;  %v930_v45 = vmul.f32 %v920_v10, %v1711_v1 }
 0x2c7   :  { %v952_v12 = vmul.f32 %v951_v22, %v950_v43  ;;  %v954_v24 = vmul.f32 %v953_v23, %v950_v43  ;;  %v924_v35 = vadd.f32 %v923_v2, %v922_v3  ;;  %v932_v36 = vadd.f32 %v931_v62, %v930_v45 }
 0x2c9   :  { %v955_v52 = vmul.f32 %v952_v12, %v1708_v28  ;;  %v961_v53 = vmul.f32 %v954_v24, %v1708_v28  ;;  %v966_v55 = vmul.f32 %v952_v12, %v1711_v1  ;;  %v969_v56 = vmul.f32 %v954_v24, %v1711_v1 }
 0x2ca   :  { %v928_v30 = vadd.f32 %v927_v46, %v924_v35  ;;  %v936_v7 = vadd.f32 %v935_v37, %v932_v36 }
 0x2cb   :  { %v956_v17 = vadd.f32 %v955_v52, %v920_v10  ;;  %v963_v20 = vadd.f32 %v962_v27, %v961_v53  ;;  %v967_v18 = vadd.f32 %v966_v55, %v964_v49  ;;  %v970_v25 = vadd.f32 %v969_v56, %v920_v10 }
 0x2cc   :  { %v929_v9 = vsub.f32 %v928_v30, %v1545_v44  ;;  %v937_v39 = vsub.f32 %v936_v7, %v1548_v48 }
 0x2cd   :  { %v958_v61 = vadd.f32 %v957_v47, %v956_v17  ;;  %v965_v8 = vadd.f32 %v964_v49, %v963_v20  ;;  %v968_v32 = vadd.f32 %v967_v18, %v962_v27  ;;  %v972_v4 = vadd.f32 %v971_v58, %v970_v25 }
 0x2cf   :  { %v960_v33 = vadd.f32 %v959_v60, %v958_v61  ;;  %v974_v54 = vadd.f32 %v973_v11, %v972_v4  ;;  %v975_v34 = vmul.f32 %v968_v32, %v965_v8  ;;  %v984_v63 = vmul.f32 %v965_v8, %v937_v39 }
 0x2d0   :  { %v989_v13 = vmul.f32 %v968_v32, %v929_v9 }
 0x2d1   :  { %v976_v57 = vmul.f32 %v974_v54, %v960_v33  ;;  %v983_v40 = vmul.f32 %v974_v54, %v929_v9  ;;  %v988_v14 = vmul.f32 %v960_v33, %v937_v39 }
 0x2d3   :  { %v977_v5 = vsub.f32 %v975_v34, %v976_v57  ;;  %v985_v41 = vsub.f32 %v983_v40, %v984_v63  ;;  %v990_v15 = vsub.f32 %v988_v14, %v989_v13 }
 0x2d5   :  { %v978_v6 = vand.u32 2147483647, %v977_v5 }
 0x2d7   :  { %vm979_vm9 = vcmp.gt.f32.partialorder %v978_v6, 1e-06 }
 0x2d8   :  { %v980_v38 = vsel %vm979_vm9, %v977_v5, 1.0 }
 0x2d9   :  { %1066 = vrcp.f32 %v980_v38 }
 0x2e3   :  { %v1067_v16 = vpop.eup %1066 }
 0x2e4   :  { %v982_v29 = vsel %vm979_vm9, %v1067_v16, 0.0 }
 0x2e5   :  { %v986_v42 = vmul.f32 %v985_v41, %v982_v29  ;;  %v991_v59 = vmul.f32 %v990_v15, %v982_v29 }
 0x2e7   :  { %v987_v19 = vadd.f32 %v986_v42, %v1708_v28  ;;  %v992_v26 = vadd.f32 %v991_v59, %v1711_v1 }
 0x2e9   :  { %993 = vst [vmem:[#allocation7] sm:$0xff] %v987_v19  ;;  %995 = vst [vmem:[#allocation7 + $0x8] sm:$0xff] %v992_v26 }
 0x2ea   :  { %1113 = shalt.err (!%p1110_p1)
}
 0x2eb   :  { %s1114_s24 = scalar_lea.hbm %s1778_s2, 256 }
 0x2ec   :  { %p1115_p2 = scmp.ne.s32.totalorder %s1778_s2, %s1114_s24  ;;  %p1118_p3 = scmp.lt.u32.totalorder %s1114_s24, %s1778_s2 }
 0x2ee   :  { %p1120_p4 = pnand %p1118_p3, %p1115_p2 }
 0x2f0   :  { %1123 = shalt.err (!%p1120_p4)
}
 0x2f1   :  { %1007 = dma.vmem_to_hbm [thread:$0]  %s1002_s20, 256, %s1778_s2, [#allocation4], %s1132_s0, %s1132_s0, %s1133_s29  }
 0x2f2   :  { %1128 = dma.done.wait [#allocation4], 256  }
 0x2f3   :  { %1129 = vsyncadd [#allocation4], 4294967040 }
 0x2f4   :  { %1011 = vsyncpa [#allocation3], 1 }
 0x2f5   :  { %1012 = vsyncpa [#allocation4], 1 }
 0x2f6   :  { %1013 = vsyncpa [#allocation5], 1 }

</bundles_post_ra>
